<compile_context>
chip_gen: v7x
topology: tpu7x:2x2x1
jax: 0.10.0
libtpu: 0.0.40
codegen_flags: <defaults>
</compile_context>

<pallas_src>
import jax
import jax.numpy as jnp
from jax import lax
from jax.experimental import pallas as pl
from jax.experimental.pallas import tpu as pltpu


# ------------------------------- in-kernel helpers --------------------------------
def _highway_apply(x, hw_refs, E, n_hw):
    """x: [N, E] -> [N, E].  hw_refs = (W3, b3) per layer, W3 columns = [gate|nonlin|lin]."""
    for l in range(n_hw):
        w3 = hw_refs[2 * l][...]                                 # [E, 3E]
        b3 = hw_refs[2 * l + 1][...]                             # [1, 3E]
        z = jnp.dot(x, w3, preferred_element_type=jnp.float32) + b3
        gate = jax.nn.sigmoid(z[:, :E])
        nonlin = jax.nn.relu(z[:, E:2 * E])
        lin = z[:, 2 * E:]
        x = gate * nonlin + (1.0 - gate) * lin
    return x


def _lstm_cell(z, c, H):
    """One LSTM cell update.  z: [B, 4H] with gate column order [i | f | o | g].

    sigmoid only over the contiguous 3H sigmoid-gate prefix, tanh only over the
    H-wide g suffix (EUP work halved vs applying both over all gate columns)."""
    sg = jax.nn.sigmoid(z[:, :3 * H])
    g = jnp.tanh(z[:, 3 * H:])
    c_new = sg[:, H:2 * H] * c + sg[:, :H] * g                   # f*c + i*g
    h_new = sg[:, 2 * H:3 * H] * jnp.tanh(c_new)                 # o*tanh(c)
    return h_new, c_new


# ----------------------------------------------------------------------------------
# Kernel A: one LSTM direction per grid program (num_layers == 1).
#   grid=(2,), "parallel"  -> each direction can run on its own TensorCore on v7x.
#   Direction d gets: its own (possibly time-reversed) copy of x, and its Wx/b/Wh.
# ----------------------------------------------------------------------------------
def make_dir_kernel(Bp, S, E, H, n_hw):
    def kernel(*refs):
        x_ref = refs[0]                                          # [1, S*Bp, E]
        hw_refs = refs[1:1 + 2 * n_hw]
        wx_ref, b_ref, wh_ref, out_ref = refs[1 + 2 * n_hw:]

        x = _highway_apply(x_ref[0], hw_refs, E, n_hw)           # [S*Bp, E]
        # Input projection for ALL timesteps hoisted out of the recurrence.
        xp = jnp.dot(x, wx_ref[0], preferred_element_type=jnp.float32) + b_ref[0]  # [S*Bp, 4H]
        wh = wh_ref[0]                                           # [H, 4H]

        h = jnp.zeros((Bp, H), jnp.float32)
        c = jnp.zeros((Bp, H), jnp.float32)
        for s in range(S):                                       # fully unrolled recurrence
            z = xp[s * Bp:(s + 1) * Bp] + jnp.dot(h, wh, preferred_element_type=jnp.float32)
            h, c = _lstm_cell(z, c, H)

        out_ref[0] = jnp.concatenate([h, c], axis=-1)            # single [Bp, 2H] store
    return kernel


# ----------------------------------------------------------------------------------
# Kernel B: full stack (any num_layers), both directions, single program.
# ----------------------------------------------------------------------------------
def make_full_kernel(Bp, S, E, H, n_hw, n_lstm):
    def kernel(*refs):
        x_ref = refs[0]                                          # [S*Bp, E]
        hw_refs = refs[1:1 + 2 * n_hw]
        lstm_refs = refs[1 + 2 * n_hw:1 + 2 * n_hw + 6 * n_lstm]
        out_ref = refs[1 + 2 * n_hw + 6 * n_lstm]                # [n_lstm, Bp, 4H]
        y_ref = refs[2 + 2 * n_hw + 6 * n_lstm]                  # scratch [S*Bp, 2H]

        layer_in = _highway_apply(x_ref[...], hw_refs, E, n_hw)  # [S*Bp, E]
        for l in range(n_lstm):
            wxf, bf, whf, wxb, bb, whb = [r[...] for r in lstm_refs[6 * l:6 * l + 6]]
            # Per-direction input projections hoisted out of the serial recurrence.
            xpf = jnp.dot(layer_in, wxf, preferred_element_type=jnp.float32) + bf  # [S*Bp, 4H]
            xpb = jnp.dot(layer_in, wxb, preferred_element_type=jnp.float32) + bb  # [S*Bp, 4H]

            h_f = jnp.zeros((Bp, H), jnp.float32)
            c_f = jnp.zeros((Bp, H), jnp.float32)
            h_b = jnp.zeros((Bp, H), jnp.float32)
            c_b = jnp.zeros((Bp, H), jnp.float32)
            collect = (l + 1 < n_lstm)

            for s in range(S):                                   # fully unrolled recurrence
                # forward direction, time s
                zf = xpf[s * Bp:(s + 1) * Bp] + jnp.dot(h_f, whf,
                                                        preferred_element_type=jnp.float32)
                h_f, c_f = _lstm_cell(zf, c_f, H)
                # backward direction, time S-1-s (static reversed indexing, no flips)
                zb = xpb[(S - 1 - s) * Bp:(S - s) * Bp] + jnp.dot(h_b, whb,
                                                                  preferred_element_type=jnp.float32)
                h_b, c_b = _lstm_cell(zb, c_b, H)
                if collect:
                    # stream next-layer input into VMEM scratch (no end-of-layer concat)
                    y_ref[s * Bp:(s + 1) * Bp, :H] = h_f
                    y_ref[(S - 1 - s) * Bp:(S - s) * Bp, H:] = h_b

            # one lane-dense (4H = 128 lane) store per layer: [h_f | h_b | c_f | c_b]
            out_ref[l] = jnp.concatenate([h_f, h_b, c_f, c_b], axis=-1)

            if collect:
                layer_in = y_ref[...]                            # [S*Bp, 2H]
    return kernel


# ----------------------------------------------------------------------------------
# Host-side weight fusion (done once inside jit; trivially small arrays)
# ----------------------------------------------------------------------------------
def _fuse_highway_params(hw_params):
    fused = []
    for (wn, bn, wl, bl, wg, bg) in hw_params:
        fused.append(jnp.concatenate([wg, wn, wl], axis=1))      # [E, 3E] = [gate|nonlin|lin]
        fused.append(jnp.concatenate([bg, bn, bl], axis=1))      # [1, 3E]
    return fused


def _dir_lstm_params(w):
    """Per-direction fused weights, gate column order [i | f | o | g]."""
    wx = jnp.concatenate([w["wxi"], w["wxf"], w["wxo"], w["wxg"]], axis=1)   # [in, 4H]
    b = jnp.concatenate([w["bi"], w["bf"], w["bo"], w["bg"]], axis=1)        # [1, 4H]
    wh = jnp.concatenate([w["whi"], w["whf"], w["who"], w["whg"]], axis=1)   # [H, 4H]
    return wx, b, wh


# ----------------------------------------------------------------------------------
# Wrappers
# ----------------------------------------------------------------------------------
def _forward_single_layer(x_tm, hw_fused, lstm_layers, B, Bp, S, E, H):
    n_hw = len(hw_fused) // 2
    w_f, w_b = lstm_layers[0]
    wxf, bf, whf = _dir_lstm_params(w_f)
    wxb, bb, whb = _dir_lstm_params(w_b)

    # direction 0: forward time order; direction 1: reversed time order (tiny, one-shot)
    x_both = jnp.stack([x_tm.reshape(S * Bp, E),
                        x_tm[::-1].reshape(S * Bp, E)], axis=0)  # [2, S*Bp, E]
    wx = jnp.stack([wxf, wxb], axis=0)                           # [2, in, 4H]
    b = jnp.stack([bf, bb], axis=0)                              # [2, 1, 4H]
    wh = jnp.stack([whf, whb], axis=0)                           # [2, H, 4H]
    args = [x_both] + list(hw_fused) + [wx, b, wh]

    in_specs = [pl.BlockSpec((1, S * Bp, E), lambda d: (d, 0, 0))]
    for p in hw_fused:
        in_specs.append(pl.BlockSpec(p.shape, lambda d: (0, 0)))
    in_specs += [pl.BlockSpec((1,) + wxf.shape, lambda d: (d, 0, 0)),
                 pl.BlockSpec((1,) + bf.shape, lambda d: (d, 0, 0)),
                 pl.BlockSpec((1,) + whf.shape, lambda d: (d, 0, 0))]

    hc = pl.pallas_call(
        make_dir_kernel(Bp, S, E, H, n_hw),
        out_shape=jax.ShapeDtypeStruct((2, Bp, 2 * H), jnp.float32),
        grid=(2,),
        in_specs=in_specs,
        out_specs=pl.BlockSpec((1, Bp, 2 * H), lambda d: (d, 0, 0)),
        compiler_params=pltpu.CompilerParams(dimension_semantics=("parallel",)),
    )(*args)

    h_n = hc[:, :B, :H]                                          # [2, B, H]  (fwd, bwd)
    c_n = hc[:, :B, H:]
    return h_n, c_n


def _forward_multi_layer(x_tm, hw_fused, lstm_layers, B, Bp, S, E, H):
    n_hw = len(hw_fused) // 2
    n_lstm = len(lstm_layers)
    args = [x_tm.reshape(S * Bp, E)] + list(hw_fused)
    for (w_f, w_b) in lstm_layers:
        args += list(_dir_lstm_params(w_f)) + list(_dir_lstm_params(w_b))

    out = pl.pallas_call(
        make_full_kernel(Bp, S, E, H, n_hw, n_lstm),
        out_shape=jax.ShapeDtypeStruct((n_lstm, Bp, 4 * H), jnp.float32),
        in_specs=[pl.BlockSpec(memory_space=pltpu.MemorySpace.VMEM) for _ in args],
        out_specs=pl.BlockSpec(memory_space=pltpu.MemorySpace.VMEM),
        scratch_shapes=[pltpu.VMEM((S * Bp, 2 * H), jnp.float32)],
    )(*args)

    h_f, h_b = out[:, :B, 0:H], out[:, :B, H:2 * H]
    c_f, c_b = out[:, :B, 2 * H:3 * H], out[:, :B, 3 * H:4 * H]
    h_n = jnp.concatenate([h_f[:, None], h_b[:, None]], axis=1).reshape(2 * n_lstm, B, H)
    c_n = jnp.concatenate([c_f[:, None], c_b[:, None]], axis=1).reshape(2 * n_lstm, B, H)
    return h_n, c_n


def original_encoder_forward(x, hw_params, lstm_layers):
    """x: [B, S, E].  Returns (h_n, c_n), each [num_layers * 2, B, H]."""
    B, S, E = x.shape
    H = lstm_layers[0][0]["whi"].shape[0]
    Bp = ((B + 7) // 8) * 8                                      # sublane-pad batch to 8

    x_tm = jnp.transpose(x, (1, 0, 2))                           # [S, B, E] time-major
    if Bp != B:
        x_tm = jnp.pad(x_tm, ((0, 0), (0, Bp - B), (0, 0)))      # zero rows, dead lanes only
    hw_fused = _fuse_highway_params(hw_params)

    if len(lstm_layers) == 1:
        return _forward_single_layer(x_tm, hw_fused, lstm_layers, B, Bp, S, E, H)
    return _forward_multi_layer(x_tm, hw_fused, lstm_layers, B, Bp, S, E, H)


# ----------------------------------------------------------------------------------
# Pure-JAX reference (unfused), for numerical validation.
# ----------------------------------------------------------------------------------
def reference_forward(x, hw_params, lstm_layers):
    B, S, E = x.shape
    h = x.reshape(-1, E)
    for (wn, bn, wl, bl, wg, bg) in hw_params:
        g = jax.nn.sigmoid(h @ wg + bg)
        n = jax.nn.relu(h @ wn + bn)
        lin = h @ wl + bl
        h = g * n + (1.0 - g) * lin
    layer_in = jnp.transpose(h.reshape(B, S, E), (1, 0, 2))      # [S, B, E]

    def run(w, xs):
        Hh = w["whi"].shape[0]

        def step(carry, x_t):
            hh, cc = carry
            i = jax.nn.sigmoid(x_t @ w["wxi"] + hh @ w["whi"] + w["bi"])
            f = jax.nn.sigmoid(x_t @ w["wxf"] + hh @ w["whf"] + w["bf"])
            g = jnp.tanh(x_t @ w["wxg"] + hh @ w["whg"] + w["bg"])
            o = jax.nn.sigmoid(x_t @ w["wxo"] + hh @ w["who"] + w["bo"])
            cc = f * cc + i * g
            hh = o * jnp.tanh(cc)
            return (hh, cc), hh

        init = (jnp.zeros((xs.shape[1], Hh), jnp.float32),
                jnp.zeros((xs.shape[1], Hh), jnp.float32))
        (hl, cl), ys = lax.scan(step, init, xs)
        return hl, cl, ys

    hs, cs = [], []
    for (w_fwd, w_bwd) in lstm_layers:
        hf, cf, yf = run(w_fwd, layer_in)
        hb, cb, yb_rev = run(w_bwd, layer_in[::-1])
        hs += [hf, hb]
        cs += [cf, cb]
        layer_in = jnp.concatenate([yf, yb_rev[::-1]], axis=-1)
    return jnp.stack(hs, axis=0), jnp.stack(cs, axis=0)


# ----------------------------------------------------------------------------------
# Deterministic synthetic parameter initialization (PyTorch-like uniform ranges)
# ----------------------------------------------------------------------------------
def init_highway_params(key, size, num_layers=2):
    k = 1.0 / (size ** 0.5)
    params = []
    for _ in range(num_layers):
        key, *ks = jax.random.split(key, 7)
        wn = jax.random.uniform(ks[0], (size, size), jnp.float32, -k, k)
        bn = jax.random.uniform(ks[1], (1, size), jnp.float32, -k, k)
        wl = jax.random.uniform(ks[2], (size, size), jnp.float32, -k, k)
        bl = jax.random.uniform(ks[3], (1, size), jnp.float32, -k, k)
        wg = jax.random.uniform(ks[4], (size, size), jnp.float32, -k, k)
        bg = jax.random.uniform(ks[5], (1, size), jnp.float32, -k, k)
        params.append((wn, bn, wl, bl, wg, bg))
    return params, key


def init_lstm_direction(key, in_size, hidden):
    k = 1.0 / (hidden ** 0.5)
    key, *ks = jax.random.split(key, 13)
    w = {}
    for idx, g in enumerate("ifgo"):
        w[f"wx{g}"] = jax.random.uniform(ks[idx], (in_size, hidden), jnp.float32, -k, k)
        w[f"wh{g}"] = jax.random.uniform(ks[4 + idx], (hidden, hidden), jnp.float32, -k, k)
        w[f"b{g}"] = jax.random.uniform(ks[8 + idx], (1, hidden), jnp.float32, -k, k)  # b_ih + b_hh
    return w, key


def init_lstm_layers(key, embed_size, hidden, num_layers, bidirectional=True):
    layers = []
    in_size = embed_size
    for _ in range(num_layers):
        w_fwd, key = init_lstm_direction(key, in_size, hidden)
        w_bwd, key = init_lstm_direction(key, in_size, hidden)
        layers.append((w_fwd, w_bwd))
        in_size = hidden * (2 if bidirectional else 1)
    return layers, key


# ----------------------------------------------------------------------------------
if __name__ == "__main__":
    # params: word_embed_size=24, sum_depth=8 -> embed_size=32; encoder_rnn_size=32;
    # encoder_num_layers=1 (default config); bidirectional=True.
    B, S = 2, 8
    word_embed_size, sum_depth = 24, 8
    E = word_embed_size + sum_depth
    H = 32

    key = jax.random.PRNGKey(0)
    hw_params, key = init_highway_params(key, E, num_layers=2)
    key, kx = jax.random.split(key)
    x = jax.random.normal(kx, (B, S, E), jnp.float32)

    fwd = jax.jit(original_encoder_forward)
    ref = jax.jit(reference_forward)

    for num_layers in (1, 2):   # 1 -> direction-parallel kernel; 2 -> full-stack kernel
        lstm_layers, key = init_lstm_layers(key, E, H, num_layers, bidirectional=True)
        h_n, c_n = fwd(x, hw_params, lstm_layers)
        jax.block_until_ready((h_n, c_n))

        assert h_n.shape == (num_layers * 2, B, H)
        assert c_n.shape == (num_layers * 2, B, H)
        assert bool(jnp.all(jnp.isfinite(h_n))) and bool(jnp.all(jnp.isfinite(c_n)))

        h_ref, c_ref = ref(x, hw_params, lstm_layers)
        jax.block_until_ready((h_ref, c_ref))
        err_h = float(jnp.max(jnp.abs(h_n - h_ref)))
        err_c = float(jnp.max(jnp.abs(c_n - c_ref)))
        assert err_h < 1e-4 and err_c < 1e-4, (num_layers, err_h, err_c)

    print("KERNEL_OK")
</pallas_src>

<mosaic_0001>
module attributes {stable_mosaic.version = 11 : i64} {
  func.func @kernel(%arg0: i32, %arg1: memref<1x64x32xf32, #tpu.memory_space<vmem>>, %arg2: memref<32x96xf32, #tpu.memory_space<vmem>>, %arg3: memref<1x96xf32, #tpu.memory_space<vmem>>, %arg4: memref<32x96xf32, #tpu.memory_space<vmem>>, %arg5: memref<1x96xf32, #tpu.memory_space<vmem>>, %arg6: memref<1x32x128xf32, #tpu.memory_space<vmem>>, %arg7: memref<1x1x128xf32, #tpu.memory_space<vmem>>, %arg8: memref<1x32x128xf32, #tpu.memory_space<vmem>>, %arg9: memref<1x8x64xf32, #tpu.memory_space<vmem>>) attributes {dimension_semantics = [#tpu.dimension_semantics<parallel>], iteration_bounds = array<i64: 2>, scalar_prefetch = 0 : i64, scratch_operands = 0 : i64, tpu.core_type = #tpu.core_type<tc>, window_params = [{transform_indices = @transform_0, window_bounds = array<i64: 1, 64, 32>}, {pipeline_mode = #tpu.pipeline_mode<synchronous>, transform_indices = @transform_1, window_bounds = array<i64: 32, 96>}, {pipeline_mode = #tpu.pipeline_mode<synchronous>, transform_indices = @transform_2, window_bounds = array<i64: 1, 96>}, {pipeline_mode = #tpu.pipeline_mode<synchronous>, transform_indices = @transform_3, window_bounds = array<i64: 32, 96>}, {pipeline_mode = #tpu.pipeline_mode<synchronous>, transform_indices = @transform_4, window_bounds = array<i64: 1, 96>}, {transform_indices = @transform_5, window_bounds = array<i64: 1, 32, 128>}, {transform_indices = @transform_6, window_bounds = array<i64: 1, 1, 128>}, {transform_indices = @transform_7, window_bounds = array<i64: 1, 32, 128>}, {transform_indices = @transform_8, window_bounds = array<i64: 1, 8, 64>}]} {
    %c0 = arith.constant 0 : index
    %c0_0 = arith.constant 0 : index
    %c0_1 = arith.constant 0 : index
    %0 = vector.load %arg1[%c0, %c0_0, %c0_1] : memref<1x64x32xf32, #tpu.memory_space<vmem>>, vector<1x64x32xf32>
    %1 = vector.shape_cast %0 : vector<1x64x32xf32> to vector<64x32xf32>
    %c0_2 = arith.constant 0 : index
    %c0_3 = arith.constant 0 : index
    %2 = vector.load %arg2[%c0_2, %c0_3] : memref<32x96xf32, #tpu.memory_space<vmem>>, vector<32x96xf32>
    %c0_4 = arith.constant 0 : index
    %c0_5 = arith.constant 0 : index
    %3 = vector.load %arg3[%c0_4, %c0_5] : memref<1x96xf32, #tpu.memory_space<vmem>>, vector<1x96xf32>
    %cst = arith.constant dense<0.000000e+00> : vector<64x96xf32>
    %4 = tpu.matmul %1, %2, %cst {dimension_numbers = #tpu.dot_dimension_numbers<[1], [0], [0], [1], [0, 0, 1, 1], [], []>} : vector<64x32xf32>, vector<32x96xf32>, vector<64x96xf32> -> vector<64x96xf32>
    %5 = vector.broadcast %3 : vector<1x96xf32> to vector<64x96xf32>
    %6 = arith.addf %4, %5 : vector<64x96xf32>
    %7 = vector.extract_strided_slice %6 {offsets = [0, 0], sizes = [64, 32], strides = [1, 1]} : vector<64x96xf32> to vector<64x32xf32>
    %8 = arith.negf %7 : vector<64x32xf32>
    %9 = math.exp %8 : vector<64x32xf32>
    %cst_6 = arith.constant 1.000000e+00 : f32
    %10 = vector.broadcast %cst_6 : f32 to vector<64x32xf32>
    %11 = arith.addf %10, %9 : vector<64x32xf32>
    %12 = arith.divf %10, %11 : vector<64x32xf32>
    %13 = vector.extract_strided_slice %6 {offsets = [0, 32], sizes = [64, 32], strides = [1, 1]} : vector<64x96xf32> to vector<64x32xf32>
    %cst_7 = arith.constant 0.000000e+00 : f32
    %14 = vector.broadcast %cst_7 : f32 to vector<64x32xf32>
    %15 = arith.maximumf %13, %14 : vector<64x32xf32>
    %16 = vector.extract_strided_slice %6 {offsets = [0, 64], sizes = [64, 32], strides = [1, 1]} : vector<64x96xf32> to vector<64x32xf32>
    %17 = arith.mulf %12, %15 : vector<64x32xf32>
    %cst_8 = arith.constant 1.000000e+00 : f32
    %18 = vector.broadcast %cst_8 : f32 to vector<64x32xf32>
    %19 = arith.subf %18, %12 : vector<64x32xf32>
    %20 = arith.mulf %19, %16 : vector<64x32xf32>
    %21 = arith.addf %17, %20 : vector<64x32xf32>
    %c0_9 = arith.constant 0 : index
    %c0_10 = arith.constant 0 : index
    %22 = vector.load %arg4[%c0_9, %c0_10] : memref<32x96xf32, #tpu.memory_space<vmem>>, vector<32x96xf32>
    %c0_11 = arith.constant 0 : index
    %c0_12 = arith.constant 0 : index
    %23 = vector.load %arg5[%c0_11, %c0_12] : memref<1x96xf32, #tpu.memory_space<vmem>>, vector<1x96xf32>
    %cst_13 = arith.constant dense<0.000000e+00> : vector<64x96xf32>
    %24 = tpu.matmul %21, %22, %cst_13 {dimension_numbers = #tpu.dot_dimension_numbers<[1], [0], [0], [1], [0, 0, 1, 1], [], []>} : vector<64x32xf32>, vector<32x96xf32>, vector<64x96xf32> -> vector<64x96xf32>
    %25 = vector.broadcast %23 : vector<1x96xf32> to vector<64x96xf32>
    %26 = arith.addf %24, %25 : vector<64x96xf32>
    %27 = vector.extract_strided_slice %26 {offsets = [0, 0], sizes = [64, 32], strides = [1, 1]} : vector<64x96xf32> to vector<64x32xf32>
    %28 = arith.negf %27 : vector<64x32xf32>
    %29 = math.exp %28 : vector<64x32xf32>
    %cst_14 = arith.constant 1.000000e+00 : f32
    %30 = vector.broadcast %cst_14 : f32 to vector<64x32xf32>
    %31 = arith.addf %30, %29 : vector<64x32xf32>
    %32 = arith.divf %30, %31 : vector<64x32xf32>
    %33 = vector.extract_strided_slice %26 {offsets = [0, 32], sizes = [64, 32], strides = [1, 1]} : vector<64x96xf32> to vector<64x32xf32>
    %cst_15 = arith.constant 0.000000e+00 : f32
    %34 = vector.broadcast %cst_15 : f32 to vector<64x32xf32>
    %35 = arith.maximumf %33, %34 : vector<64x32xf32>
    %36 = vector.extract_strided_slice %26 {offsets = [0, 64], sizes = [64, 32], strides = [1, 1]} : vector<64x96xf32> to vector<64x32xf32>
    %37 = arith.mulf %32, %35 : vector<64x32xf32>
    %cst_16 = arith.constant 1.000000e+00 : f32
    %38 = vector.broadcast %cst_16 : f32 to vector<64x32xf32>
    %39 = arith.subf %38, %32 : vector<64x32xf32>
    %40 = arith.mulf %39, %36 : vector<64x32xf32>
    %41 = arith.addf %37, %40 : vector<64x32xf32>
    %c0_17 = arith.constant 0 : index
    %c0_18 = arith.constant 0 : index
    %c0_19 = arith.constant 0 : index
    %42 = vector.load %arg6[%c0_17, %c0_18, %c0_19] : memref<1x32x128xf32, #tpu.memory_space<vmem>>, vector<1x32x128xf32>
    %43 = vector.shape_cast %42 : vector<1x32x128xf32> to vector<32x128xf32>
    %cst_20 = arith.constant dense<0.000000e+00> : vector<64x128xf32>
    %44 = tpu.matmul %41, %43, %cst_20 {dimension_numbers = #tpu.dot_dimension_numbers<[1], [0], [0], [1], [0, 0, 1, 1], [], []>} : vector<64x32xf32>, vector<32x128xf32>, vector<64x128xf32> -> vector<64x128xf32>
    %c0_21 = arith.constant 0 : index
    %c0_22 = arith.constant 0 : index
    %c0_23 = arith.constant 0 : index
    %45 = vector.load %arg7[%c0_21, %c0_22, %c0_23] : memref<1x1x128xf32, #tpu.memory_space<vmem>>, vector<1x1x128xf32>
    %46 = vector.shape_cast %45 : vector<1x1x128xf32> to vector<1x128xf32>
    %47 = vector.broadcast %46 : vector<1x128xf32> to vector<64x128xf32>
    %48 = arith.addf %44, %47 : vector<64x128xf32>
    %c0_24 = arith.constant 0 : index
    %c0_25 = arith.constant 0 : index
    %c0_26 = arith.constant 0 : index
    %49 = vector.load %arg8[%c0_24, %c0_25, %c0_26] : memref<1x32x128xf32, #tpu.memory_space<vmem>>, vector<1x32x128xf32>
    %50 = vector.shape_cast %49 : vector<1x32x128xf32> to vector<32x128xf32>
    %cst_27 = arith.constant 0.000000e+00 : f32
    %51 = vector.broadcast %cst_27 : f32 to vector<8x32xf32>
    %cst_28 = arith.constant 0.000000e+00 : f32
    %52 = vector.broadcast %cst_28 : f32 to vector<8x32xf32>
    %53 = vector.extract_strided_slice %48 {offsets = [0, 0], sizes = [8, 128], strides = [1, 1]} : vector<64x128xf32> to vector<8x128xf32>
    %cst_29 = arith.constant dense<0.000000e+00> : vector<8x128xf32>
    %54 = tpu.matmul %51, %50, %cst_29 {dimension_numbers = #tpu.dot_dimension_numbers<[1], [0], [0], [1], [0, 0, 1, 1], [], []>} : vector<8x32xf32>, vector<32x128xf32>, vector<8x128xf32> -> vector<8x128xf32>
    %55 = arith.addf %53, %54 : vector<8x128xf32>
    %56 = vector.extract_strided_slice %55 {offsets = [0, 0], sizes = [8, 96], strides = [1, 1]} : vector<8x128xf32> to vector<8x96xf32>
    %57 = arith.negf %56 : vector<8x96xf32>
    %58 = math.exp %57 : vector<8x96xf32>
    %cst_30 = arith.constant 1.000000e+00 : f32
    %59 = vector.broadcast %cst_30 : f32 to vector<8x96xf32>
    %60 = arith.addf %59, %58 : vector<8x96xf32>
    %61 = arith.divf %59, %60 : vector<8x96xf32>
    %62 = vector.extract_strided_slice %55 {offsets = [0, 96], sizes = [8, 32], strides = [1, 1]} : vector<8x128xf32> to vector<8x32xf32>
    %63 = math.tanh %62 : vector<8x32xf32>
    %64 = vector.extract_strided_slice %61 {offsets = [0, 32], sizes = [8, 32], strides = [1, 1]} : vector<8x96xf32> to vector<8x32xf32>
    %65 = arith.mulf %64, %52 : vector<8x32xf32>
    %66 = vector.extract_strided_slice %61 {offsets = [0, 0], sizes = [8, 32], strides = [1, 1]} : vector<8x96xf32> to vector<8x32xf32>
    %67 = arith.mulf %66, %63 : vector<8x32xf32>
    %68 = arith.addf %65, %67 : vector<8x32xf32>
    %69 = vector.extract_strided_slice %61 {offsets = [0, 64], sizes = [8, 32], strides = [1, 1]} : vector<8x96xf32> to vector<8x32xf32>
    %70 = math.tanh %68 : vector<8x32xf32>
    %71 = arith.mulf %69, %70 : vector<8x32xf32>
    %72 = vector.extract_strided_slice %48 {offsets = [8, 0], sizes = [8, 128], strides = [1, 1]} : vector<64x128xf32> to vector<8x128xf32>
    %cst_31 = arith.constant dense<0.000000e+00> : vector<8x128xf32>
    %73 = tpu.matmul %71, %50, %cst_31 {dimension_numbers = #tpu.dot_dimension_numbers<[1], [0], [0], [1], [0, 0, 1, 1], [], []>} : vector<8x32xf32>, vector<32x128xf32>, vector<8x128xf32> -> vector<8x128xf32>
    %74 = arith.addf %72, %73 : vector<8x128xf32>
    %75 = vector.extract_strided_slice %74 {offsets = [0, 0], sizes = [8, 96], strides = [1, 1]} : vector<8x128xf32> to vector<8x96xf32>
    %76 = arith.negf %75 : vector<8x96xf32>
    %77 = math.exp %76 : vector<8x96xf32>
    %cst_32 = arith.constant 1.000000e+00 : f32
    %78 = vector.broadcast %cst_32 : f32 to vector<8x96xf32>
    %79 = arith.addf %78, %77 : vector<8x96xf32>
    %80 = arith.divf %78, %79 : vector<8x96xf32>
    %81 = vector.extract_strided_slice %74 {offsets = [0, 96], sizes = [8, 32], strides = [1, 1]} : vector<8x128xf32> to vector<8x32xf32>
    %82 = math.tanh %81 : vector<8x32xf32>
    %83 = vector.extract_strided_slice %80 {offsets = [0, 32], sizes = [8, 32], strides = [1, 1]} : vector<8x96xf32> to vector<8x32xf32>
    %84 = arith.mulf %83, %68 : vector<8x32xf32>
    %85 = vector.extract_strided_slice %80 {offsets = [0, 0], sizes = [8, 32], strides = [1, 1]} : vector<8x96xf32> to vector<8x32xf32>
    %86 = arith.mulf %85, %82 : vector<8x32xf32>
    %87 = arith.addf %84, %86 : vector<8x32xf32>
    %88 = vector.extract_strided_slice %80 {offsets = [0, 64], sizes = [8, 32], strides = [1, 1]} : vector<8x96xf32> to vector<8x32xf32>
    %89 = math.tanh %87 : vector<8x32xf32>
    %90 = arith.mulf %88, %89 : vector<8x32xf32>
    %91 = vector.extract_strided_slice %48 {offsets = [16, 0], sizes = [8, 128], strides = [1, 1]} : vector<64x128xf32> to vector<8x128xf32>
    %cst_33 = arith.constant dense<0.000000e+00> : vector<8x128xf32>
    %92 = tpu.matmul %90, %50, %cst_33 {dimension_numbers = #tpu.dot_dimension_numbers<[1], [0], [0], [1], [0, 0, 1, 1], [], []>} : vector<8x32xf32>, vector<32x128xf32>, vector<8x128xf32> -> vector<8x128xf32>
    %93 = arith.addf %91, %92 : vector<8x128xf32>
    %94 = vector.extract_strided_slice %93 {offsets = [0, 0], sizes = [8, 96], strides = [1, 1]} : vector<8x128xf32> to vector<8x96xf32>
    %95 = arith.negf %94 : vector<8x96xf32>
    %96 = math.exp %95 : vector<8x96xf32>
    %cst_34 = arith.constant 1.000000e+00 : f32
    %97 = vector.broadcast %cst_34 : f32 to vector<8x96xf32>
    %98 = arith.addf %97, %96 : vector<8x96xf32>
    %99 = arith.divf %97, %98 : vector<8x96xf32>
    %100 = vector.extract_strided_slice %93 {offsets = [0, 96], sizes = [8, 32], strides = [1, 1]} : vector<8x128xf32> to vector<8x32xf32>
    %101 = math.tanh %100 : vector<8x32xf32>
    %102 = vector.extract_strided_slice %99 {offsets = [0, 32], sizes = [8, 32], strides = [1, 1]} : vector<8x96xf32> to vector<8x32xf32>
    %103 = arith.mulf %102, %87 : vector<8x32xf32>
    %104 = vector.extract_strided_slice %99 {offsets = [0, 0], sizes = [8, 32], strides = [1, 1]} : vector<8x96xf32> to vector<8x32xf32>
    %105 = arith.mulf %104, %101 : vector<8x32xf32>
    %106 = arith.addf %103, %105 : vector<8x32xf32>
    %107 = vector.extract_strided_slice %99 {offsets = [0, 64], sizes = [8, 32], strides = [1, 1]} : vector<8x96xf32> to vector<8x32xf32>
    %108 = math.tanh %106 : vector<8x32xf32>
    %109 = arith.mulf %107, %108 : vector<8x32xf32>
    %110 = vector.extract_strided_slice %48 {offsets = [24, 0], sizes = [8, 128], strides = [1, 1]} : vector<64x128xf32> to vector<8x128xf32>
    %cst_35 = arith.constant dense<0.000000e+00> : vector<8x128xf32>
    %111 = tpu.matmul %109, %50, %cst_35 {dimension_numbers = #tpu.dot_dimension_numbers<[1], [0], [0], [1], [0, 0, 1, 1], [], []>} : vector<8x32xf32>, vector<32x128xf32>, vector<8x128xf32> -> vector<8x128xf32>
    %112 = arith.addf %110, %111 : vector<8x128xf32>
    %113 = vector.extract_strided_slice %112 {offsets = [0, 0], sizes = [8, 96], strides = [1, 1]} : vector<8x128xf32> to vector<8x96xf32>
    %114 = arith.negf %113 : vector<8x96xf32>
    %115 = math.exp %114 : vector<8x96xf32>
    %cst_36 = arith.constant 1.000000e+00 : f32
    %116 = vector.broadcast %cst_36 : f32 to vector<8x96xf32>
    %117 = arith.addf %116, %115 : vector<8x96xf32>
    %118 = arith.divf %116, %117 : vector<8x96xf32>
    %119 = vector.extract_strided_slice %112 {offsets = [0, 96], sizes = [8, 32], strides = [1, 1]} : vector<8x128xf32> to vector<8x32xf32>
    %120 = math.tanh %119 : vector<8x32xf32>
    %121 = vector.extract_strided_slice %118 {offsets = [0, 32], sizes = [8, 32], strides = [1, 1]} : vector<8x96xf32> to vector<8x32xf32>
    %122 = arith.mulf %121, %106 : vector<8x32xf32>
    %123 = vector.extract_strided_slice %118 {offsets = [0, 0], sizes = [8, 32], strides = [1, 1]} : vector<8x96xf32> to vector<8x32xf32>
    %124 = arith.mulf %123, %120 : vector<8x32xf32>
    %125 = arith.addf %122, %124 : vector<8x32xf32>
    %126 = vector.extract_strided_slice %118 {offsets = [0, 64], sizes = [8, 32], strides = [1, 1]} : vector<8x96xf32> to vector<8x32xf32>
    %127 = math.tanh %125 : vector<8x32xf32>
    %128 = arith.mulf %126, %127 : vector<8x32xf32>
    %129 = vector.extract_strided_slice %48 {offsets = [32, 0], sizes = [8, 128], strides = [1, 1]} : vector<64x128xf32> to vector<8x128xf32>
    %cst_37 = arith.constant dense<0.000000e+00> : vector<8x128xf32>
    %130 = tpu.matmul %128, %50, %cst_37 {dimension_numbers = #tpu.dot_dimension_numbers<[1], [0], [0], [1], [0, 0, 1, 1], [], []>} : vector<8x32xf32>, vector<32x128xf32>, vector<8x128xf32> -> vector<8x128xf32>
    %131 = arith.addf %129, %130 : vector<8x128xf32>
    %132 = vector.extract_strided_slice %131 {offsets = [0, 0], sizes = [8, 96], strides = [1, 1]} : vector<8x128xf32> to vector<8x96xf32>
    %133 = arith.negf %132 : vector<8x96xf32>
    %134 = math.exp %133 : vector<8x96xf32>
    %cst_38 = arith.constant 1.000000e+00 : f32
    %135 = vector.broadcast %cst_38 : f32 to vector<8x96xf32>
    %136 = arith.addf %135, %134 : vector<8x96xf32>
    %137 = arith.divf %135, %136 : vector<8x96xf32>
    %138 = vector.extract_strided_slice %131 {offsets = [0, 96], sizes = [8, 32], strides = [1, 1]} : vector<8x128xf32> to vector<8x32xf32>
    %139 = math.tanh %138 : vector<8x32xf32>
    %140 = vector.extract_strided_slice %137 {offsets = [0, 32], sizes = [8, 32], strides = [1, 1]} : vector<8x96xf32> to vector<8x32xf32>
    %141 = arith.mulf %140, %125 : vector<8x32xf32>
    %142 = vector.extract_strided_slice %137 {offsets = [0, 0], sizes = [8, 32], strides = [1, 1]} : vector<8x96xf32> to vector<8x32xf32>
    %143 = arith.mulf %142, %139 : vector<8x32xf32>
    %144 = arith.addf %141, %143 : vector<8x32xf32>
    %145 = vector.extract_strided_slice %137 {offsets = [0, 64], sizes = [8, 32], strides = [1, 1]} : vector<8x96xf32> to vector<8x32xf32>
    %146 = math.tanh %144 : vector<8x32xf32>
    %147 = arith.mulf %145, %146 : vector<8x32xf32>
    %148 = vector.extract_strided_slice %48 {offsets = [40, 0], sizes = [8, 128], strides = [1, 1]} : vector<64x128xf32> to vector<8x128xf32>
    %cst_39 = arith.constant dense<0.000000e+00> : vector<8x128xf32>
    %149 = tpu.matmul %147, %50, %cst_39 {dimension_numbers = #tpu.dot_dimension_numbers<[1], [0], [0], [1], [0, 0, 1, 1], [], []>} : vector<8x32xf32>, vector<32x128xf32>, vector<8x128xf32> -> vector<8x128xf32>
    %150 = arith.addf %148, %149 : vector<8x128xf32>
    %151 = vector.extract_strided_slice %150 {offsets = [0, 0], sizes = [8, 96], strides = [1, 1]} : vector<8x128xf32> to vector<8x96xf32>
    %152 = arith.negf %151 : vector<8x96xf32>
    %153 = math.exp %152 : vector<8x96xf32>
    %cst_40 = arith.constant 1.000000e+00 : f32
    %154 = vector.broadcast %cst_40 : f32 to vector<8x96xf32>
    %155 = arith.addf %154, %153 : vector<8x96xf32>
    %156 = arith.divf %154, %155 : vector<8x96xf32>
    %157 = vector.extract_strided_slice %150 {offsets = [0, 96], sizes = [8, 32], strides = [1, 1]} : vector<8x128xf32> to vector<8x32xf32>
    %158 = math.tanh %157 : vector<8x32xf32>
    %159 = vector.extract_strided_slice %156 {offsets = [0, 32], sizes = [8, 32], strides = [1, 1]} : vector<8x96xf32> to vector<8x32xf32>
    %160 = arith.mulf %159, %144 : vector<8x32xf32>
    %161 = vector.extract_strided_slice %156 {offsets = [0, 0], sizes = [8, 32], strides = [1, 1]} : vector<8x96xf32> to vector<8x32xf32>
    %162 = arith.mulf %161, %158 : vector<8x32xf32>
    %163 = arith.addf %160, %162 : vector<8x32xf32>
    %164 = vector.extract_strided_slice %156 {offsets = [0, 64], sizes = [8, 32], strides = [1, 1]} : vector<8x96xf32> to vector<8x32xf32>
    %165 = math.tanh %163 : vector<8x32xf32>
    %166 = arith.mulf %164, %165 : vector<8x32xf32>
    %167 = vector.extract_strided_slice %48 {offsets = [48, 0], sizes = [8, 128], strides = [1, 1]} : vector<64x128xf32> to vector<8x128xf32>
    %cst_41 = arith.constant dense<0.000000e+00> : vector<8x128xf32>
    %168 = tpu.matmul %166, %50, %cst_41 {dimension_numbers = #tpu.dot_dimension_numbers<[1], [0], [0], [1], [0, 0, 1, 1], [], []>} : vector<8x32xf32>, vector<32x128xf32>, vector<8x128xf32> -> vector<8x128xf32>
    %169 = arith.addf %167, %168 : vector<8x128xf32>
    %170 = vector.extract_strided_slice %169 {offsets = [0, 0], sizes = [8, 96], strides = [1, 1]} : vector<8x128xf32> to vector<8x96xf32>
    %171 = arith.negf %170 : vector<8x96xf32>
    %172 = math.exp %171 : vector<8x96xf32>
    %cst_42 = arith.constant 1.000000e+00 : f32
    %173 = vector.broadcast %cst_42 : f32 to vector<8x96xf32>
    %174 = arith.addf %173, %172 : vector<8x96xf32>
    %175 = arith.divf %173, %174 : vector<8x96xf32>
    %176 = vector.extract_strided_slice %169 {offsets = [0, 96], sizes = [8, 32], strides = [1, 1]} : vector<8x128xf32> to vector<8x32xf32>
    %177 = math.tanh %176 : vector<8x32xf32>
    %178 = vector.extract_strided_slice %175 {offsets = [0, 32], sizes = [8, 32], strides = [1, 1]} : vector<8x96xf32> to vector<8x32xf32>
    %179 = arith.mulf %178, %163 : vector<8x32xf32>
    %180 = vector.extract_strided_slice %175 {offsets = [0, 0], sizes = [8, 32], strides = [1, 1]} : vector<8x96xf32> to vector<8x32xf32>
    %181 = arith.mulf %180, %177 : vector<8x32xf32>
    %182 = arith.addf %179, %181 : vector<8x32xf32>
    %183 = vector.extract_strided_slice %175 {offsets = [0, 64], sizes = [8, 32], strides = [1, 1]} : vector<8x96xf32> to vector<8x32xf32>
    %184 = math.tanh %182 : vector<8x32xf32>
    %185 = arith.mulf %183, %184 : vector<8x32xf32>
    %186 = vector.extract_strided_slice %48 {offsets = [56, 0], sizes = [8, 128], strides = [1, 1]} : vector<64x128xf32> to vector<8x128xf32>
    %cst_43 = arith.constant dense<0.000000e+00> : vector<8x128xf32>
    %187 = tpu.matmul %185, %50, %cst_43 {dimension_numbers = #tpu.dot_dimension_numbers<[1], [0], [0], [1], [0, 0, 1, 1], [], []>} : vector<8x32xf32>, vector<32x128xf32>, vector<8x128xf32> -> vector<8x128xf32>
    %188 = arith.addf %186, %187 : vector<8x128xf32>
    %189 = vector.extract_strided_slice %188 {offsets = [0, 0], sizes = [8, 96], strides = [1, 1]} : vector<8x128xf32> to vector<8x96xf32>
    %190 = arith.negf %189 : vector<8x96xf32>
    %191 = math.exp %190 : vector<8x96xf32>
    %cst_44 = arith.constant 1.000000e+00 : f32
    %192 = vector.broadcast %cst_44 : f32 to vector<8x96xf32>
    %193 = arith.addf %192, %191 : vector<8x96xf32>
    %194 = arith.divf %192, %193 : vector<8x96xf32>
    %195 = vector.extract_strided_slice %188 {offsets = [0, 96], sizes = [8, 32], strides = [1, 1]} : vector<8x128xf32> to vector<8x32xf32>
    %196 = math.tanh %195 : vector<8x32xf32>
    %197 = vector.extract_strided_slice %194 {offsets = [0, 32], sizes = [8, 32], strides = [1, 1]} : vector<8x96xf32> to vector<8x32xf32>
    %198 = arith.mulf %197, %182 : vector<8x32xf32>
    %199 = vector.extract_strided_slice %194 {offsets = [0, 0], sizes = [8, 32], strides = [1, 1]} : vector<8x96xf32> to vector<8x32xf32>
    %200 = arith.mulf %199, %196 : vector<8x32xf32>
    %201 = arith.addf %198, %200 : vector<8x32xf32>
    %202 = vector.extract_strided_slice %194 {offsets = [0, 64], sizes = [8, 32], strides = [1, 1]} : vector<8x96xf32> to vector<8x32xf32>
    %203 = math.tanh %201 : vector<8x32xf32>
    %204 = arith.mulf %202, %203 : vector<8x32xf32>
    %205 = tpu.concatenate %204, %201 in 1 : vector<8x32xf32>, vector<8x32xf32> -> vector<8x64xf32>
    %c0_45 = arith.constant 0 : index
    %c0_46 = arith.constant 0 : index
    %c0_47 = arith.constant 0 : index
    %206 = vector.load %arg9[%c0_45, %c0_46, %c0_47] : memref<1x8x64xf32, #tpu.memory_space<vmem>>, vector<1x8x64xf32>
    %207 = vector.shape_cast %206 : vector<1x8x64xf32> to vector<8x64xf32>
    %208 = vector.shape_cast %205 : vector<8x64xf32> to vector<1x8x64xf32>
    tpu.vector_store %arg9[%c0_45, %c0_46, %c0_47], %208 {strides = array<i32>} : memref<1x8x64xf32, #tpu.memory_space<vmem>>, vector<1x8x64xf32>,
    return
  }
  func.func @transform_0(%arg0: i32) -> (i32, i32, i32) {
    %c0_i32 = arith.constant 0 : i32
    %c0_i32_0 = arith.constant 0 : i32
    %c0_i32_1 = arith.constant 0 : i32
    return %arg0, %c0_i32, %c0_i32_0 : i32, i32, i32
  }
  func.func @transform_1(%arg0: i32) -> (i32, i32) {
    %c0_i32 = arith.constant 0 : i32
    %c0_i32_0 = arith.constant 0 : i32
    %c0_i32_1 = arith.constant 0 : i32
    return %c0_i32, %c0_i32_0 : i32, i32
  }
  func.func @transform_2(%arg0: i32) -> (i32, i32) {
    %c0_i32 = arith.constant 0 : i32
    %c0_i32_0 = arith.constant 0 : i32
    %c0_i32_1 = arith.constant 0 : i32
    return %c0_i32, %c0_i32_0 : i32, i32
  }
  func.func @transform_3(%arg0: i32) -> (i32, i32) {
    %c0_i32 = arith.constant 0 : i32
    %c0_i32_0 = arith.constant 0 : i32
    %c0_i32_1 = arith.constant 0 : i32
    return %c0_i32, %c0_i32_0 : i32, i32
  }
  func.func @transform_4(%arg0: i32) -> (i32, i32) {
    %c0_i32 = arith.constant 0 : i32
    %c0_i32_0 = arith.constant 0 : i32
    %c0_i32_1 = arith.constant 0 : i32
    return %c0_i32, %c0_i32_0 : i32, i32
  }
  func.func @transform_5(%arg0: i32) -> (i32, i32, i32) {
    %c0_i32 = arith.constant 0 : i32
    %c0_i32_0 = arith.constant 0 : i32
    %c0_i32_1 = arith.constant 0 : i32
    return %arg0, %c0_i32, %c0_i32_0 : i32, i32, i32
  }
  func.func @transform_6(%arg0: i32) -> (i32, i32, i32) {
    %c0_i32 = arith.constant 0 : i32
    %c0_i32_0 = arith.constant 0 : i32
    %c0_i32_1 = arith.constant 0 : i32
    return %arg0, %c0_i32, %c0_i32_0 : i32, i32, i32
  }
  func.func @transform_7(%arg0: i32) -> (i32, i32, i32) {
    %c0_i32 = arith.constant 0 : i32
    %c0_i32_0 = arith.constant 0 : i32
    %c0_i32_1 = arith.constant 0 : i32
    return %arg0, %c0_i32, %c0_i32_0 : i32, i32, i32
  }
  func.func @transform_8(%arg0: i32) -> (i32, i32, i32) {
    %c0_i32 = arith.constant 0 : i32
    %c0_i32_0 = arith.constant 0 : i32
    %c0_i32_1 = arith.constant 0 : i32
    return %arg0, %c0_i32, %c0_i32_0 : i32, i32, i32
  }
}

</mosaic_0001>

<bundles_post_ra>
// kernel: original_encoder_forward.1
= control target key start
LH: loop header
LB: loop body
LE: loop exit
PB: predicated region body
PF: predicated region fallthrough
CT: control target
= control target key end

     0   :  { %s2558_s27 = smov 0   ;;  %s2823_s0 = inlined_call_operand.vmem [shape: f32[2,64,32], index: 0, kind: input, shape index: {}]   ;;  %s2824_s1 = inlined_call_operand.vmem [shape: f32[32,96], index: 1, kind: input, shape index: {}]   ;;  %s2825_s2 = inlined_call_operand.vmem [shape: f32[1,96], index: 2, kind: input, shape index: {}]   ;;  %s2826_s3 = inlined_call_operand.vmem [shape: f32[32,96], index: 3, kind: input, shape index: {}]   ;;  %s2827_s4 = inlined_call_operand.vmem [shape: f32[1,96], index: 4, kind: input, shape index: {}]   ;;  %s2828_s5 = inlined_call_operand.vmem [shape: f32[2,32,128], index: 5, kind: input, shape index: {}]   ;;  %s2829_s6 = inlined_call_operand.vmem [shape: f32[2,1,128], index: 6, kind: input, shape index: {}]   ;;  %s2830_s7 = inlined_call_operand.vmem [shape: f32[2,32,128], index: 7, kind: input, shape index: {}]   ;;  %s2831_s8 = inlined_call_operand.vmem [shape: f32[2,8,64], index: 8, kind: output, shape index: {}]  }
   0x1 LB: > { %s1986_s28 = sadd.s32 4294967295, %s2505_s27   ;;  %p1990_p0 = scmp.ge.s32.totalorder %s2505_s27, 1  ;;  %s2505_s27 = sphi %s2558_s27, %s18_s27  }
   0x2   : > { %p290_p1 = scmp.lt.s32.totalorder %s2505_s27, 3 }
   0x4   : > { %p291_p2 = pnand %p1990_p0, %p290_p1 }
   0x5   : > { %v366_v0 = vld [vmem:[%s2824_s1] sm:$0xff] (!%p291_p2)  ;;  %v367_v1 = vld [vmem:[%s2824_s1 + $0x8] sm:$0xff] (!%p291_p2)  ;;  %v368_v2 = vld [vmem:[%s2824_s1 + $0x10] sm:$0xff] (!%p291_p2)  ;;  %p336_p3 = scmp.lt.s32.totalorder (!%p291_p2), %s1986_s28, 1  ;;  %vm377_vm0 = vcmask (!%p291_p2), 261120   ;;  %s2507_s9 = smov (!%p291_p2), 96  }
   0x6   : > { %294 = sbr.rel (%p291_p2) target bundleno = 6320 (0x18b0), region = 52  ;;  %v2285_v3 = vpack.c.bf16 (!%p291_p2), %v367_v1, %v366_v0  ;;  %v369_v4 = vld [vmem:[%s2824_s1 + $0x18] sm:$0xff] (!%p291_p2)  ;;  %v659_v14 = vld [vmem:[%s2826_s3] sm:$0xff] (!%p291_p2)  ;;  %v660_v15 = vld [vmem:[%s2826_s3 + $0x8] sm:$0xff] (!%p291_p2)  ;;  %s2508_s10 = smov (!%p291_p2), 64   ;;  %vm2510_vm1 = vmmov (!%p291_p2), 0  }
   0x7   : > { %v2289_v5 = vpack.c.bf16 (!%p291_p2), %v369_v4, %v368_v2  ;;  %v2293_v16 = vpack.c.bf16 (!%p291_p2), %v660_v15, %v659_v14  ;;  %v661_v17 = vld [vmem:[%s2826_s3 + $0x10] sm:$0xff] (!%p291_p2)  ;;  %v662_v18 = vld [vmem:[%s2826_s3 + $0x18] sm:$0xff] (!%p291_p2)  ;;  %v1998_v20 = vld [vmem:[%s2825_s2] ss:$0 sm:$0xff] (!%p291_p2)  ;;  %s2512_s23 = smov (!%p291_p2), 32   ;;  %vm1898_vm2 = vcmask (!%p291_p2), 523264  }
   0x8   : > { %2286 = vmatprep.subr.bf16.mxu0 (!%p291_p2), %v2285_v3  ;;  %v2297_v19 = vpack.c.bf16 (!%p291_p2), %v662_v18, %v661_v17 }
   0x9   : > { %2288 = vmatpush3.bf16.msra.mxu0 (!%p291_p2), %v2285_v3  ;;  %2294 = vmatprep.subr.bf16.mxu1 (!%p291_p2), %v2293_v16 }
   0xa   : > { %2290 = vmatprep.subr.bf16.mxu0 (!%p291_p2), %v2289_v5  ;;  %2296 = vmatpush3.bf16.msra.mxu1 (!%p291_p2), %v2293_v16 }
   0xb   : > { %2298 = vmatprep.subr.bf16.mxu1 (!%p291_p2), %v2297_v19 }
   0xd   : > { %s2833_s28 = smov (!%p336_p3, %s1986_s28), 1  ;;  %2292 = vmatpush3.bf16.msra.mxu0 %v2289_v5 }
   0xe   : > { %s2058_s15 = sshll.u32 %s2833_s28, 6  ;;  %2300 = vmatpush3.bf16.msra.mxu1 %v2297_v19  ;;  %s2059_s11 = sshll.u32 %s2833_s28, 5 }
   0xf   : > { %s340_s18 = scalar_lea.vmem %s2823_s0, %s2058_s15  ;;  %s345_s14 = scalar_lea.vmem %s2828_s5, %s2059_s11 }
  0x10   : > { %v358_v6 = vld [vmem:[%s340_s18] sm:$0xff]  ;;  %v359_v7 = vld [vmem:[%s340_s18 + $0x8] sm:$0xff]  ;;  %v360_v8 = vld [vmem:[%s340_s18 + $0x10] sm:$0xff]  ;;  %s353_s17 = scalar_lea.vmem %s2830_s7, %s2059_s11  ;;  %s348_s22 = scalar_lea.vmem %s2829_s6, %s2833_s28 }
  0x11   : > { %2145 = vmatprep.mubr.msk.f32.mxu0 %vm377_vm0, %v358_v6  ;;  %v361_v9 = vld [vmem:[%s340_s18 + $0x18] sm:$0xff]  ;;  %v362_v10 = vld [vmem:[%s340_s18 + $0x20] sm:$0xff]  ;;  %v363_v11 = vld [vmem:[%s340_s18 + $0x28] sm:$0xff]  ;;  %s1997_s24 = sshll.u32 %s2833_s28, 3 }
  0x12   : > { %2146 = vmatmul.mubr.msk.f32.vlgmr.msra.gmra.mrb[0].mxu0 %vm377_vm0, %v359_v7  ;;  %v364_v12 = vld [vmem:[%s340_s18 + $0x30] sm:$0xff]  ;;  %v365_v13 = vld [vmem:[%s340_s18 + $0x38] sm:$0xff]  ;;  %s357_s29 = scalar_lea.vmem %s2831_s8, %s1997_s24 }
  0x13   : > { %2148 = vmatprep.mubr.msk.f32.mxu0 %vm377_vm0, %v360_v8 }
  0x16   : > { %2149 = vmatmul.mubr.msk.f32.gmra.mrb[2].mxu0 %vm377_vm0, %v361_v9 }
  0x17   : > { %2151 = vmatprep.mubr.msk.f32.mxu0 %vm377_vm0, %v362_v10 }
  0x1a   : > { %2152 = vmatmul.mubr.msk.f32.gmra.mrb[4].mxu0 %vm377_vm0, %v363_v11 }
  0x1b   : > { %2154 = vmatprep.mubr.msk.f32.mxu0 %vm377_vm0, %v364_v12 }
  0x1e   : > { %2155 = vmatmul.mubr.msk.f32.gmra.mrb[6].mxu0 %vm377_vm0, %v365_v13 }
  0xe5   : > { %v2147_v21 = vpop.f32.mrb[0].mxu0 }
  0xe6   : > { %v474_v22 = vadd.f32 %v2147_v21, %v1998_v20  ;;  %v468_v23 = vpop.f32.mrb[1].mxu0 }
  0xe7   : > { %v469_v24 = vadd.f32 %v1998_v20, %v468_v23 }
  0xe8   : > { %v556_v25 = vmax.f32 %v474_v22, 0.0  ;;  %v2008_v27 = vmul.f32 -1.442695, %v474_v22 }
  0xe9   : > { %v555_v26 = vmax.f32 %v469_v24, 0.0  ;;  %v2007_v28 = vmul.f32 -1.442695, %v469_v24  ;;  %v2150_v29 = vpop.f32.mrb[2].mxu0 }
  0xea   : > { %573 = vrot.lane.b32.xlu1 %v556_v25, %s2507_s9  ;;  %2371 = vpow2.f32 %v2008_v27  ;;  %v484_v30 = vadd.f32 %v2150_v29, %v1998_v20  ;;  %v478_v31 = vpop.f32.mrb[3].mxu0 }
  0xeb   : > { %571 = vrot.lane.b32.xlu0 %v555_v26, %s2507_s9  ;;  %2373 = vpow2.f32 %v2007_v28  ;;  %v479_v32 = vadd.f32 %v1998_v20, %v478_v31 }
  0xec   : > { %v558_v33 = vmax.f32 %v484_v30, 0.0  ;;  %v2010_v1 = vmul.f32 -1.442695, %v484_v30 }
  0xed   : > { %v557_v34 = vmax.f32 %v479_v32, 0.0  ;;  %v2153_v35 = vpop.f32.mrb[4].mxu0  ;;  %v2009_v2 = vmul.f32 -1.442695, %v479_v32 }
  0xee   : > { %621 = vrot.lane.b32.xlu1 %v474_v22, %s2508_s10  ;;  %v494_v37 = vadd.f32 %v2153_v35, %v1998_v20  ;;  %v488_v38 = vpop.f32.mrb[5].mxu0 }
  0xef   : > { %619 = vrot.lane.b32.xlu0 %v469_v24, %s2508_s10  ;;  %v489_v40 = vadd.f32 %v1998_v20, %v488_v38 }
  0xf0   : > { %v560_v41 = vmax.f32 %v494_v37, 0.0  ;;  %v2012_v5 = vmul.f32 -1.442695, %v494_v37 }
  0xf1   : > { %v2156_v43 = vpop.f32.mrb[6].mxu0  ;;  %v559_v46 = vmax.f32 %v489_v40, 0.0  ;;  %v2011_v3 = vmul.f32 -1.442695, %v489_v40 }
  0xf2   : > { %625 = vrot.lane.b32.xlu1 %v484_v30, %s2508_s10  ;;  %v504_v45 = vadd.f32 %v2156_v43, %v1998_v20  ;;  %v498_v47 = vpop.f32.mrb[7].mxu0 }
  0xf3   : > { %577 = vrot.lane.b32.xlu0 %v558_v33, %s2507_s9  ;;  %v499_v48 = vadd.f32 %v1998_v20, %v498_v47 }
  0xf4   : > { %v2372_v36 = vpop.eup %2371  ;;  %v562_v49 = vmax.f32 %v504_v45, 0.0  ;;  %v2014_v8 = vmul.f32 -1.442695, %v504_v45 }
  0xf5   : > { %v2374_v39 = vpop.eup %2373  ;;  %v532_v42 = vadd.f32 1.0, %v2372_v36  ;;  %v561_v50 = vmax.f32 %v499_v48, 0.0  ;;  %v2013_v9 = vmul.f32 -1.442695, %v499_v48 }
  0xf6   : > { %623 = vrot.lane.b32.xlu1 %v479_v32, %s2508_s10  ;;  %v531_v44 = vadd.f32 1.0, %v2374_v39 }
  0xf7   : > { %575 = vrot.lane.b32.xlu0 %v557_v34, %s2507_s9  ;;  %2375 = vrcp.f32 %v532_v42 }
  0xf8   : > { %2377 = vrcp.f32 %v531_v44 }
  0xf9   : > { %2379 = vpow2.f32 %v2010_v1  ;;  %v1092_v1 = vld [vmem:[%s353_s17 + $0x8] sm:$0xff] }
  0xfa   : > { %629 = vrot.lane.b32.xlu1 %v494_v37, %s2508_s10  ;;  %2381 = vpow2.f32 %v2009_v2 }
  0xfb   : > { %581 = vrot.lane.b32.xlu0 %v560_v41, %s2507_s9  ;;  %2383 = vpow2.f32 %v2011_v3  ;;  %v1093_v3 = vld [vmem:[%s353_s17 + $0x10] sm:$0xff] }
  0xfc   : > { %2385 = vpow2.f32 %v2012_v5 }
  0xfe   : > { %627 = vrot.lane.b32.xlu1 %v489_v40, %s2508_s10 }
  0xff   : > { %579 = vrot.lane.b32.xlu0 %v559_v46, %s2507_s9 }
 0x101   : > { %v2376_v51 = vpop.eup %2375 }
 0x102   : > { %633 = vrot.lane.b32.xlu1 %v504_v45, %s2508_s10  ;;  %v2378_v53 = vpop.eup %2377  ;;  %v604_v55 = vsub.f32 1.0, %v2376_v51 }
 0x103   : > { %585 = vrot.lane.b32.xlu0 %v562_v49, %s2507_s9  ;;  %v603_v57 = vsub.f32 1.0, %v2378_v53  ;;  %v2380_v4 = vpop.eup %2379 }
 0x104   : > { %v534_v6 = vadd.f32 1.0, %v2380_v4  ;;  %v2382_v7 = vpop.eup %2381  ;;  %v1094_v4 = vld [vmem:[%s353_s17 + $0x18] sm:$0xff] }
 0x105   : > { %v533_v10 = vadd.f32 1.0, %v2382_v7  ;;  %v2384_v11 = vpop.eup %2383  ;;  %v953_v7 = vld [vmem:[%s345_s14 + $0x10] sm:$0xff] }
 0x106   : > { %631 = vrot.lane.b32.xlu1 %v499_v48, %s2508_s10  ;;  %2387 = vrcp.f32 %v534_v6  ;;  %v2386_v12 = vpop.eup %2385  ;;  %v535_v13 = vadd.f32 1.0, %v2384_v11  ;;  %v2641_v6 = vpack.c.bf16 %v1094_v4, %v1093_v3 }
 0x107   : > { %583 = vrot.lane.b32.xlu0 %v561_v50, %s2507_s9  ;;  %2389 = vpow2.f32 %v2014_v8  ;;  %v536_v15 = vadd.f32 1.0, %v2386_v12  ;;  %v954_v8 = vld [vmem:[%s345_s14 + $0x18] sm:$0xff] }
 0x108   : > { %2391 = vpow2.f32 %v2013_v9  ;;  %v2305_v9 = vpack.c.bf16 %v954_v8, %v953_v7 }
 0x109   : > { %2393 = vrcp.f32 %v533_v10  ;;  %v2651_v10 = vld [vmem:[%s2827_s4] ss:$0 sm:$0xff] }
 0x10a   : > { %2395 = vrcp.f32 %v535_v13 }
 0x10b   : > { %2397 = vrcp.f32 %v536_v15 }
 0x110   : > { %v2388_v14 = vpop.eup %2387 }
 0x111   : > { %v2390_v16 = vpop.eup %2389  ;;  %v606_v18 = vsub.f32 1.0, %v2388_v14 }
 0x112   : > { %v2392_v19 = vpop.eup %2391  ;;  %v538_v25 = vadd.f32 1.0, %v2390_v16 }
 0x113   : > { %v2394_v20 = vpop.eup %2393  ;;  %v537_v22 = vadd.f32 1.0, %v2392_v19 }
 0x114   : > { %v605_v26 = vsub.f32 1.0, %v2394_v20  ;;  %v2396_v33 = vpop.eup %2395 }
 0x115   : > { %2399 = vrcp.f32 %v537_v22  ;;  %v2398_v36 = vpop.eup %2397  ;;  %v607_v37 = vsub.f32 1.0, %v2396_v33 }
 0x116   : > { %2401 = vrcp.f32 %v538_v25  ;;  %v608_v38 = vsub.f32 1.0, %v2398_v36 }
 0x11f   : > { %v2400_v46 = vpop.eup %2399 }
 0x120   : > { %v2402_v50 = vpop.eup %2401 }
 0x15c   : > { %v574_v52 = vpop.permute.xlu1 %573 }
 0x15d   : > { %v572_v54 = vpop.permute.xlu0 %571  ;;  %v596_v62 = vmul.f32 %v2376_v51, %v574_v52  ;;  %v609_v51 = vsub.f32 1.0, %v2400_v46  ;;  %v610_v52 = vsub.f32 1.0, %v2402_v50 }
 0x15e   : > { %v595_v60 = vmul.f32 %v2378_v53, %v572_v54 }
 0x160   : > { %v622_v56 = vpop.permute.xlu1 %621 }
 0x161   : > { %v644_v58 = vmul.f32 %v622_v56, %v604_v55  ;;  %v620_v59 = vpop.permute.xlu0 %619 }
 0x162   : > { %v643_v61 = vmul.f32 %v620_v59, %v603_v57 }
 0x163   : > { %v652_v0 = vadd.f32 %v644_v58, %v596_v62  ;;  %v2509_v58 = vmov 0.0|0.0   ;;  %v1091_v62 = vld [vmem:[%s353_s17] sm:$0xff] }
 0x164   : > { %v651_v63 = vadd.f32 %v643_v61, %v595_v60  ;;  %v626_v17 = vpop.permute.xlu1 %625  ;;  %2309 = vmatprep.subr.bf16.mxu1 %v2509_v58  ;;  %v951_v60 = vld [vmem:[%s345_s14] sm:$0xff]  ;;  %v952_v61 = vld [vmem:[%s345_s14 + $0x8] sm:$0xff]  ;;  %v2637_v5 = vpack.c.bf16 %v1092_v1, %v1091_v62 }
 0x165   : > { %v578_v21 = vpop.permute.xlu0 %577  ;;  %v646_v23 = vmul.f32 %v626_v17, %v606_v18 }
 0x166   : > { %2165 = vmatprep.mubr.msk.f32.mxu1 %vm377_vm0, %v651_v63  ;;  %v598_v24 = vmul.f32 %v2388_v14, %v578_v21  ;;  %v2511_v14 = vmov 0.0  }
 0x167   : > { %2166 = vmatmul.mubr.msk.f32.vlgmr.msra.gmra.mrb[0].mxu1 %vm377_vm0, %v652_v0  ;;  %v2301_v0 = vpack.c.bf16 %v952_v61, %v951_v60 }
 0x168   : > { %v624_v27 = vpop.permute.xlu1 %623  ;;  %v654_v31 = vadd.f32 %v646_v23, %v598_v24  ;;  %2311 = vmatpush3.bf16.msra.mxu1 %v2637_v5 }
 0x169   : > { %v576_v28 = vpop.permute.xlu0 %575  ;;  %v645_v29 = vmul.f32 %v624_v27, %v605_v26  ;;  %2302 = vmatprep.subr.bf16.mxu0 %v2301_v0  ;;  %2312 = vmatprep.subr.bf16.mxu1 %v2509_v58 }
 0x16a   : > { %v597_v30 = vmul.f32 %v2394_v20, %v576_v28  ;;  %2304 = vmatpush3.bf16.msra.mxu0 %v2301_v0 }
 0x16b   : > { %2306 = vmatprep.subr.bf16.mxu0 %v2305_v9 }
 0x16c   : > { %v653_v32 = vadd.f32 %v645_v29, %v597_v30  ;;  %v630_v34 = vpop.permute.xlu1 %629  ;;  %2314 = vmatpush3.bf16.msra.mxu1 %v2641_v6 }
 0x16d   : > { %v582_v35 = vpop.permute.xlu0 %581  ;;  %v648_v43 = vmul.f32 %v630_v34, %v608_v38  ;;  %2315 = vmatprep.subr.bf16.mxu1 %v2509_v58 }
 0x16e   : > { %2168 = vmatprep.mubr.msk.f32.mxu1 %vm377_vm0, %v653_v32  ;;  %v600_v44 = vmul.f32 %v2398_v36, %v582_v35  ;;  %2308 = vmatpush3.bf16.msra.mxu0 %v2305_v9 }
 0x16f   : > { %2169 = vmatmul.mubr.msk.f32.gmra.mrb[2].mxu1 %vm377_vm0, %v654_v31  ;;  %2321 = vmatprep.subr.bf16.mxu0 %v2509_v58 }
 0x170   : > { %v628_v39 = vpop.permute.xlu1 %627  ;;  %v656_v47 = vadd.f32 %v648_v43, %v600_v44 }
 0x171   : > { %v580_v40 = vpop.permute.xlu0 %579  ;;  %v647_v41 = vmul.f32 %v628_v39, %v607_v37 }
 0x172   : > { %v599_v42 = vmul.f32 %v2396_v33, %v580_v40 }
 0x174   : > { %v655_v45 = vadd.f32 %v647_v41, %v599_v42  ;;  %v634_v48 = vpop.permute.xlu1 %633 }
 0x175   : > { %v586_v49 = vpop.permute.xlu0 %585  ;;  %v650_v59 = vmul.f32 %v634_v48, %v610_v52 }
 0x176   : > { %2171 = vmatprep.mubr.msk.f32.mxu1 %vm377_vm0, %v655_v45  ;;  %v602_v53 = vmul.f32 %v2402_v50, %v586_v49 }
 0x177   : > { %2172 = vmatmul.mubr.msk.f32.gmra.mrb[4].mxu1 %vm377_vm0, %v656_v47 }
 0x178   : > { %v632_v54 = vpop.permute.xlu1 %631  ;;  %v658_v2 = vadd.f32 %v650_v59, %v602_v53 }
 0x179   : > { %v584_v55 = vpop.permute.xlu0 %583  ;;  %v649_v56 = vmul.f32 %v632_v54, %v609_v51 }
 0x17a   : > { %v601_v57 = vmul.f32 %v2400_v46, %v584_v55  ;;  %v2690_v46 = vld [vmem:[%s348_s22] ss:$0 sm:$0xff] }
 0x17c   : > { %v657_v63 = vadd.f32 %v649_v56, %v601_v57 }
 0x17e   : > { %2174 = vmatprep.mubr.msk.f32.mxu1 %vm377_vm0, %v657_v63 }
 0x17f   : > { %2175 = vmatmul.mubr.msk.f32.gmra.mrb[6].mxu1 %vm377_vm0, %v658_v2 }
 0x180   : > { %2205 = vmatprep.mubr.msk.f32.mxu1 %vm2510_vm1, %v2511_v14 }
 0x183   : > { %2206 = vmatmul.mubr.f32.vlgmr.msra.gmra.mrb[8].mxu1 %v2511_v14 }
 0x184   : > { %2317 = vmatpush3.bf16.msra.mxu1 %v2637_v5  ;;  %2216 = vmatprep.mubr.msk.f32.mxu1 %vm2510_vm1, %v2511_v14 }
 0x185   : > { %2318 = vmatprep.subr.bf16.mxu1 %v2509_v58 }
 0x188   : > { %2320 = vmatpush3.bf16.msra.mxu1 %v2641_v6 }
 0x189   : > { %2327 = vmatprep.subr.bf16.mxu1 %v2509_v58 }
 0x23a   : > { %v2167_v11 = vpop.f32.mrb[0].mxu1 }
 0x23b   : > { %v760_v12 = vpop.f32.mrb[1].mxu1  ;;  %v766_v15 = vadd.f32 %v2167_v11, %v2651_v10 }
 0x23c   : > { %v761_v13 = vadd.f32 %v2651_v10, %v760_v12 }
 0x23d   : > { %v848_v17 = vmax.f32 %v766_v15, 0.0  ;;  %v2025_v19 = vmul.f32 -1.442695, %v766_v15 }
 0x23e   : > { %911 = vrot.lane.b32.xlu1 %v761_v13, %s2508_s10  ;;  %v847_v16 = vmax.f32 %v761_v13, 0.0  ;;  %v2024_v18 = vmul.f32 -1.442695, %v761_v13 }
 0x240   : > { %863 = vrot.lane.b32.xlu0 %v847_v16, %s2507_s9  ;;  %2403 = vpow2.f32 %v2024_v18 }
 0x241   : > { %2405 = vpow2.f32 %v2025_v19 }
 0x242   : > { %913 = vrot.lane.b32.xlu1 %v766_v15, %s2508_s10  ;;  %v2668_v20 = vpop.f32.mrb[2].mxu1 }
 0x243   : > { %v2670_v21 = vpop.f32.mrb[3].mxu1  ;;  %v776_v18 = vadd.f32 %v2668_v20, %v2651_v10 }
 0x244   : > { %865 = vrot.lane.b32.xlu0 %v848_v17, %s2507_s9  ;;  %v771_v16 = vadd.f32 %v2651_v10, %v2670_v21 }
 0x246   : > { %v849_v19 = vmax.f32 %v771_v16, 0.0 }
 0x24a   : > { %v2404_v22 = vpop.eup %2403  ;;  %v2672_v23 = vpop.f32.mrb[4].mxu1 }
 0x24b   : > { %v2674_v24 = vpop.f32.mrb[5].mxu1  ;;  %v823_v25 = vadd.f32 1.0, %v2404_v22  ;;  %v2406_v26 = vpop.eup %2405 }
 0x24c   : > { %v824_v27 = vadd.f32 1.0, %v2406_v26  ;;  %v781_v22 = vadd.f32 %v2651_v10, %v2674_v24  ;;  %v786_v26 = vadd.f32 %v2672_v23, %v2651_v10 }
 0x24d   : > { %2407 = vrcp.f32 %v823_v25  ;;  %v850_v25 = vmax.f32 %v776_v18, 0.0 }
 0x24e   : > { %2409 = vrcp.f32 %v824_v27  ;;  %v851_v27 = vmax.f32 %v781_v22, 0.0 }
 0x252   : > { %v2676_v28 = vpop.f32.mrb[6].mxu1 }
 0x253   : > { %v2678_v29 = vpop.f32.mrb[7].mxu1  ;;  %v796_v20 = vadd.f32 %v2676_v28, %v2651_v10  ;;  %v2027_v28 = vmul.f32 -1.442695, %v776_v18 }
 0x254   : > { %v791_v21 = vadd.f32 %v2651_v10, %v2678_v29  ;;  %v2026_v10 = vmul.f32 -1.442695, %v771_v16  ;;  %v2028_v29 = vmul.f32 -1.442695, %v781_v22 }
 0x255   : > { %v854_v24 = vmax.f32 %v796_v20, 0.0 }
 0x256   : > { %v1164_v44 = vpop.f32.mrb[8].mxu1 }
 0x257   : > { %v2408_v30 = vpop.eup %2407  ;;  %v2207_v45 = vpop.f32.mrb[9].mxu1 }
 0x258   : > { %v895_v32 = vsub.f32 1.0, %v2408_v30  ;;  %v2410_v33 = vpop.eup %2409 }
 0x259   : > { %v896_v39 = vsub.f32 1.0, %v2410_v33 }
 0x2b0   : > { %v912_v31 = vpop.permute.xlu1 %911 }
 0x2b1   : > { %v935_v35 = vmul.f32 %v912_v31, %v895_v32  ;;  %v853_v31 = vmax.f32 %v791_v21, 0.0 }
 0x2b2   : > { %v864_v34 = vpop.permute.xlu0 %863 }
 0x2b3   : > { %v887_v36 = vmul.f32 %v2408_v30, %v864_v34  ;;  %v852_v30 = vmax.f32 %v786_v26, 0.0 }
 0x2b4   : > { %v914_v37 = vpop.permute.xlu1 %913 }
 0x2b5   : > { %v943_v38 = vadd.f32 %v935_v35, %v887_v36  ;;  %v936_v41 = vmul.f32 %v914_v37, %v896_v39  ;;  %v2029_v35 = vmul.f32 -1.442695, %v786_v26  ;;  %v2030_v37 = vmul.f32 -1.442695, %v791_v21 }
 0x2b6   : > { %v866_v40 = vpop.permute.xlu0 %865 }
 0x2b7   : > { %v888_v42 = vmul.f32 %v2410_v33, %v866_v40  ;;  %2185 = vmatprep.mubr.msk.f32.mxu0 %vm377_vm0, %v943_v38  ;;  %v2031_v40 = vmul.f32 -1.442695, %v796_v20 }
 0x2b9   : > { %v944_v43 = vadd.f32 %v936_v41, %v888_v42 }
 0x2bb   : > { %2186 = vmatmul.mubr.msk.f32.vlgmr.msra.gmra.mrb[8].mxu0 %vm377_vm0, %v944_v43 }
 0x2bc   : > { %2323 = vmatpush3.bf16.msra.mxu0 %v2637_v5 }
 0x2bd   : > { %2324 = vmatprep.subr.bf16.mxu0 %v2509_v58 }
 0x2c0   : > { %2326 = vmatpush3.bf16.msra.mxu0 %v2641_v6 }
 0x2c1   : > { %2333 = vmatprep.subr.bf16.mxu0 %v2509_v58 }
 0x38e   : > { %v2187_v47 = vpop.f32.mrb[8].mxu0 }
 0x38f   : > { %v1052_v48 = vpop.f32.mrb[9].mxu0  ;;  %v1058_v2 = vadd.f32 %v2187_v47, %v2690_v46 }
 0x390   : > { %v1053_v49 = vadd.f32 %v2690_v46, %v1052_v48 }
 0x392   : > { %v1168_v50 = vadd.f32 %v1164_v44, %v1053_v49 }
 0x394   : > { %2411 = vtanh.f32 %v1168_v50  ;;  %v2041_v52 = vmul.f32 -1.442695, %v1168_v50 }
 0x396   : > { %2413 = vpow2.f32 %v2041_v52 }
 0x39e   : > { %v2412_v51 = vpop.eup %2411 }
 0x39f   : > { %1178 = vrot.lane.b32.xlu0 %v2412_v51, %s2512_s23 }
 0x3a0   : > { %v2414_v53 = vpop.eup %2413 }
 0x3a1   : > { %v1172_v54 = vadd.f32 1.0, %v2414_v53 }
 0x3a3   : > { %2415 = vrcp.f32 %v1172_v54 }
 0x3ad   : > { %v2416_v55 = vpop.eup %2415 }
 0x3ae   : > { %v1176_v59 = vmul.f32 0.0, %v2416_v55 }
 0x411   : > { %v1179_v56 = vpop.permute.xlu0 %1178 }
 0x412   : > { %v1181_v57 = vmul.f32 %v2416_v55, %v1179_v56 }
 0x414   : > { %1183 = vrot.lane.b32.xlu1 %v1181_v57, %s2512_s23 }
 0x486   : > { %v1184_v60 = vpop.permute.xlu1 %1183 }
 0x487   : > { %v1186_v61 = vadd.f32 %v1184_v60, %v1176_v59 }
 0x489   : > { %2417 = vtanh.f32 %v1186_v61 }
 0x493   : > { %v2418_v62 = vpop.eup %2417 }
 0x494   : > { %1189 = vrot.lane.b32.xlu0 %v2418_v62, %s2512_s23 }
 0x506   : > { %v1190_v63 = vpop.permute.xlu0 %1189 }
 0x507   : > { %v1192_v0 = vmul.f32 %v2416_v55, %v1190_v63 }
 0x509   : > { %1194 = vrot.lane.b32.xlu1 %v1192_v0, %s2508_s10 }
 0x57b   : > { %v1195_v1 = vpop.permute.xlu1 %1194 }
 0x57c   : > { %2217 = vmatmul.mubr.msk.f32.vlgmr.msra.gmra.mrb[10].mxu1 %vm377_vm0, %v1195_v1 }
 0x57d   : > { %2329 = vmatpush3.bf16.msra.mxu1 %v2637_v5  ;;  %2238 = vmatprep.mubr.msk.f32.mxu1 %vm2510_vm1, %v2511_v14 }
 0x57e   : > { %2330 = vmatprep.subr.bf16.mxu1 %v2509_v58 }
 0x581   : > { %2332 = vmatpush3.bf16.msra.mxu1 %v2641_v6 }
 0x582   : > { %2339 = vmatprep.subr.bf16.mxu1 %v2509_v58 }
 0x64f   : > { %v1264_v3 = vpop.f32.mrb[10].mxu1 }
 0x650   : > { %v1268_v4 = vadd.f32 %v1264_v3, %v1058_v2  ;;  %v2218_v7 = vpop.f32.mrb[11].mxu1 }
 0x652   : > { %2419 = vtanh.f32 %v1268_v4  ;;  %v2043_v9 = vmul.f32 -1.442695, %v1268_v4 }
 0x654   : > { %2421 = vpow2.f32 %v2043_v9 }
 0x65c   : > { %v2420_v8 = vpop.eup %2419 }
 0x65d   : > { %1278 = vrot.lane.b32.xlu0 %v2420_v8, %s2512_s23 }
 0x65e   : > { %v2422_v11 = vpop.eup %2421 }
 0x65f   : > { %v1272_v12 = vadd.f32 1.0, %v2422_v11 }
 0x661   : > { %2423 = vrcp.f32 %v1272_v12 }
 0x66b   : > { %v2424_v13 = vpop.eup %2423 }
 0x66c   : > { %v1276_v32 = vmul.f32 %v2424_v13, %v1186_v61 }
 0x6cf   : > { %v1279_v15 = vpop.permute.xlu0 %1278 }
 0x6d0   : > { %v1281_v17 = vmul.f32 %v2424_v13, %v1279_v15 }
 0x6d2   : > { %1283 = vrot.lane.b32.xlu1 %v1281_v17, %s2512_s23 }
 0x6d6   : > { %867 = vrot.lane.b32.xlu1 %v849_v19, %s2507_s9 }
 0x6da   : > { %869 = vrot.lane.b32.xlu1 %v850_v25, %s2507_s9 }
 0x6de   : > { %871 = vrot.lane.b32.xlu1 %v851_v27, %s2507_s9 }
 0x6e2   : > { %873 = vrot.lane.b32.xlu1 %v852_v30, %s2507_s9 }
 0x6e6   : > { %875 = vrot.lane.b32.xlu1 %v853_v31, %s2507_s9 }
 0x6ea   : > { %877 = vrot.lane.b32.xlu1 %v854_v24, %s2507_s9 }
 0x744   : > { %v1284_v23 = vpop.permute.xlu1 %1283 }
 0x745   : > { %v2725_v33 = vadd.f32 %v1284_v23, %v1276_v32 }
 0x747   : > { %2425 = vtanh.f32 %v2725_v33 }
 0x748   : > { %2427 = vpow2.f32 %v2026_v10  ;;  %v868_v43 = vpop.permute.xlu1 %867 }
 0x749   : > { %2429 = vpow2.f32 %v2027_v28 }
 0x74a   : > { %2431 = vpow2.f32 %v2028_v29 }
 0x74b   : > { %2433 = vpow2.f32 %v2029_v35 }
 0x74c   : > { %2435 = vpow2.f32 %v2030_v37  ;;  %v870_v48 = vpop.permute.xlu1 %869 }
 0x750   : > { %v872_v57 = vpop.permute.xlu1 %871 }
 0x751   : > { %v2426_v34 = vpop.eup %2425 }
 0x752   : > { %1289 = vrot.lane.b32.xlu0 %v2426_v34, %s2512_s23  ;;  %v2428_v36 = vpop.eup %2427 }
 0x753   : > { %v825_v38 = vadd.f32 1.0, %v2428_v36  ;;  %v2430_v39 = vpop.eup %2429 }
 0x754   : > { %v826_v41 = vadd.f32 1.0, %v2430_v39  ;;  %v2432_v42 = vpop.eup %2431  ;;  %v874_v7 = vpop.permute.xlu1 %873 }
 0x755   : > { %2437 = vrcp.f32 %v825_v38  ;;  %v827_v44 = vadd.f32 1.0, %v2432_v42  ;;  %v2434_v45 = vpop.eup %2433 }
 0x756   : > { %915 = vrot.lane.b32.xlu0 %v771_v16, %s2508_s10  ;;  %2439 = vpow2.f32 %v2031_v40  ;;  %v828_v47 = vadd.f32 1.0, %v2434_v45  ;;  %v2436_v49 = vpop.eup %2435 }
 0x757   : > { %2441 = vrcp.f32 %v826_v41  ;;  %v829_v53 = vadd.f32 1.0, %v2436_v49 }
 0x758   : > { %2443 = vrcp.f32 %v827_v44  ;;  %v876_v19 = vpop.permute.xlu1 %875 }
 0x759   : > { %2445 = vrcp.f32 %v828_v47 }
 0x75a   : > { %917 = vrot.lane.b32.xlu0 %v776_v18, %s2508_s10  ;;  %2447 = vrcp.f32 %v829_v53 }
 0x75c   : > { %v878_v32 = vpop.permute.xlu1 %877 }
 0x75e   : > { %919 = vrot.lane.b32.xlu0 %v781_v22, %s2508_s10 }
 0x75f   : > { %v2438_v50 = vpop.eup %2437 }
 0x760   : > { %v2440_v54 = vpop.eup %2439  ;;  %v897_v55 = vsub.f32 1.0, %v2438_v50  ;;  %v889_v60 = vmul.f32 %v2438_v50, %v868_v43 }
 0x761   : > { %v2442_v56 = vpop.eup %2441  ;;  %v830_v62 = vadd.f32 1.0, %v2440_v54 }
 0x762   : > { %921 = vrot.lane.b32.xlu0 %v786_v26, %s2508_s10  ;;  %v898_v0 = vsub.f32 1.0, %v2442_v56  ;;  %v2444_v1 = vpop.eup %2443  ;;  %v890_v3 = vmul.f32 %v2442_v56, %v870_v48 }
 0x763   : > { %2449 = vrcp.f32 %v830_v62  ;;  %v899_v9 = vsub.f32 1.0, %v2444_v1  ;;  %v2446_v11 = vpop.eup %2445 }
 0x764   : > { %v900_v17 = vsub.f32 1.0, %v2446_v11  ;;  %v2448_v18 = vpop.eup %2447  ;;  %v892_v25 = vmul.f32 %v2446_v11, %v874_v7 }
 0x765   : > { %v893_v31 = vmul.f32 %v2448_v18, %v876_v19 }
 0x766   : > { %923 = vrot.lane.b32.xlu0 %v791_v21, %s2508_s10  ;;  %v901_v21 = vsub.f32 1.0, %v2448_v18 }
 0x76a   : > { %925 = vrot.lane.b32.xlu0 %v796_v20, %s2508_s10 }
 0x76d   : > { %v2450_v30 = vpop.eup %2449 }
 0x76e   : > { %v902_v34 = vsub.f32 1.0, %v2450_v30  ;;  %v894_v28 = vmul.f32 %v2450_v30, %v878_v32 }
 0x7c4   : > { %v1290_v51 = vpop.permute.xlu0 %1289 }
 0x7c5   : > { %v1292_v52 = vmul.f32 %v2424_v13, %v1290_v51  ;;  %v891_v13 = vmul.f32 %v2444_v1, %v872_v57 }
 0x7c7   : > { %1294 = vrot.lane.b32.xlu1 %v1292_v52, %s2508_s10 }
 0x7c8   : > { %v916_v59 = vpop.permute.xlu0 %915 }
 0x7c9   : > { %v937_v61 = vmul.f32 %v916_v59, %v897_v55 }
 0x7cb   : > { %v945_v63 = vadd.f32 %v937_v61, %v889_v60 }
 0x7cc   : > { %v918_v2 = vpop.permute.xlu0 %917 }
 0x7cd   : > { %v938_v4 = vmul.f32 %v918_v2, %v898_v0  ;;  %2188 = vmatprep.mubr.msk.f32.mxu0 %vm377_vm0, %v945_v63 }
 0x7cf   : > { %v946_v8 = vadd.f32 %v938_v4, %v890_v3 }
 0x7d0   : > { %v920_v12 = vpop.permute.xlu0 %919 }
 0x7d1   : > { %v939_v15 = vmul.f32 %v920_v12, %v899_v9  ;;  %2189 = vmatmul.mubr.msk.f32.gmra.mrb[10].mxu0 %vm377_vm0, %v946_v8 }
 0x7d3   : > { %v947_v16 = vadd.f32 %v939_v15, %v891_v13 }
 0x7d4   : > { %v922_v22 = vpop.permute.xlu0 %921 }
 0x7d5   : > { %v940_v26 = vmul.f32 %v922_v22, %v900_v17  ;;  %2191 = vmatprep.mubr.msk.f32.mxu0 %vm377_vm0, %v947_v16 }
 0x7d7   : > { %v948_v27 = vadd.f32 %v940_v26, %v892_v25 }
 0x7d8   : > { %v924_v20 = vpop.permute.xlu0 %923 }
 0x7d9   : > { %v941_v24 = vmul.f32 %v924_v20, %v901_v21  ;;  %2192 = vmatmul.mubr.msk.f32.gmra.mrb[12].mxu0 %vm377_vm0, %v948_v27 }
 0x7db   : > { %v949_v23 = vadd.f32 %v941_v24, %v893_v31 }
 0x7dc   : > { %v926_v10 = vpop.permute.xlu0 %925 }
 0x7dd   : > { %v942_v29 = vmul.f32 %v926_v10, %v902_v34  ;;  %2194 = vmatprep.mubr.msk.f32.mxu0 %vm377_vm0, %v949_v23 }
 0x7df   : > { %v950_v35 = vadd.f32 %v942_v29, %v894_v28 }
 0x7e1   : > { %2195 = vmatmul.mubr.msk.f32.gmra.mrb[14].mxu0 %vm377_vm0, %v950_v35 }
 0x7e2   : > { %2227 = vmatprep.mubr.msk.f32.mxu0 %vm2510_vm1, %v2511_v14 }
 0x839   : > { %v1295_v36 = vpop.permute.xlu1 %1294 }
 0x83a   : > { %2228 = vmatmul.mubr.msk.f32.vlgmr.msra.gmra.mrb[16].mxu0 %vm377_vm0, %v1295_v36 }
 0x83b   : > { %2335 = vmatpush3.bf16.msra.mxu0 %v2637_v5  ;;  %2249 = vmatprep.mubr.msk.f32.mxu0 %vm2510_vm1, %v2511_v14 }
 0x83c   : > { %2336 = vmatprep.subr.bf16.mxu0 %v2509_v58 }
 0x83f   : > { %2338 = vmatpush3.bf16.msra.mxu0 %v2641_v6 }
 0x840   : > { %2345 = vmatprep.subr.bf16.mxu0 %v2509_v58 }
 0x8a4   : > { %v2190_v37 = vpop.f32.mrb[10].mxu0 }
 0x8a5   : > { %v1062_v38 = vpop.f32.mrb[11].mxu0 }
 0x8a6   : > { %v1063_v43 = vadd.f32 %v2690_v46, %v1062_v38 }
 0x8ac   : > { %v2751_v39 = vpop.f32.mrb[12].mxu0 }
 0x8ad   : > { %v2753_v40 = vpop.f32.mrb[13].mxu0  ;;  %v1078_v38 = vadd.f32 %v2751_v39, %v2690_v46 }
 0x8ae   : > { %v1073_v22 = vadd.f32 %v2690_v46, %v2753_v40 }
 0x8b4   : > { %v2755_v41 = vpop.f32.mrb[14].mxu0 }
 0x8b5   : > { %v2757_v42 = vpop.f32.mrb[15].mxu0 }
 0x90d   : > { %v1364_v44 = vpop.f32.mrb[16].mxu0 }
 0x90e   : > { %v1368_v45 = vadd.f32 %v1364_v44, %v1063_v43  ;;  %v2229_v47 = vpop.f32.mrb[17].mxu0 }
 0x910   : > { %2451 = vtanh.f32 %v1368_v45  ;;  %v2045_v49 = vmul.f32 -1.442695, %v1368_v45 }
 0x912   : > { %2453 = vpow2.f32 %v2045_v49 }
 0x91a   : > { %v2452_v48 = vpop.eup %2451 }
 0x91b   : > { %1378 = vrot.lane.b32.xlu0 %v2452_v48, %s2512_s23 }
 0x91c   : > { %v2454_v50 = vpop.eup %2453 }
 0x91d   : > { %v1372_v51 = vadd.f32 1.0, %v2454_v50 }
 0x91f   : > { %2455 = vrcp.f32 %v1372_v51 }
 0x929   : > { %v2456_v52 = vpop.eup %2455 }
 0x92a   : > { %v1376_v55 = vmul.f32 %v2456_v52, %v2725_v33  ;;  %v1068_v33 = vadd.f32 %v2190_v37, %v2690_v46 }
 0x98d   : > { %v1379_v53 = vpop.permute.xlu0 %1378 }
 0x98e   : > { %v1381_v54 = vmul.f32 %v2456_v52, %v1379_v53 }
 0x990   : > { %1383 = vrot.lane.b32.xlu1 %v1381_v54, %s2512_s23 }
 0xa02   : > { %v1384_v56 = vpop.permute.xlu1 %1383 }
 0xa03   : > { %v1386_v57 = vadd.f32 %v1384_v56, %v1376_v55  ;;  %v1083_v55 = vadd.f32 %v2690_v46, %v2757_v42 }
 0xa05   : > { %2457 = vtanh.f32 %v1386_v57 }
 0xa0f   : > { %v2458_v59 = vpop.eup %2457 }
 0xa10   : > { %1389 = vrot.lane.b32.xlu0 %v2458_v59, %s2512_s23 }
 0xa82   : > { %v1390_v60 = vpop.permute.xlu0 %1389 }
 0xa83   : > { %v1392_v61 = vmul.f32 %v2456_v52, %v1390_v60 }
 0xa85   : > { %1394 = vrot.lane.b32.xlu1 %v1392_v61, %s2508_s10 }
 0xaf7   : > { %v1395_v62 = vpop.permute.xlu1 %1394 }
 0xaf8   : > { %2239 = vmatmul.mubr.msk.f32.vlgmr.msra.gmra.mrb[12].mxu1 %vm377_vm0, %v1395_v62 }
 0xaf9   : > { %2341 = vmatpush3.bf16.msra.mxu1 %v2637_v5  ;;  %2260 = vmatprep.mubr.msk.f32.mxu1 %vm2510_vm1, %v2511_v14 }
 0xafa   : > { %2342 = vmatprep.subr.bf16.mxu1 %v2509_v58 }
 0xafd   : > { %2344 = vmatpush3.bf16.msra.mxu1 %v2641_v6 }
 0xafe   : > { %2351 = vmatprep.subr.bf16.mxu1 %v2509_v58 }
 0xbcb   : > { %v1464_v63 = vpop.f32.mrb[12].mxu1 }
 0xbcc   : > { %v1468_v0 = vadd.f32 %v1464_v63, %v1068_v33  ;;  %v2240_v1 = vpop.f32.mrb[13].mxu1 }
 0xbce   : > { %2459 = vtanh.f32 %v1468_v0  ;;  %v2047_v3 = vmul.f32 -1.442695, %v1468_v0 }
 0xbd0   : > { %2461 = vpow2.f32 %v2047_v3 }
 0xbd8   : > { %v2460_v2 = vpop.eup %2459 }
 0xbd9   : > { %1478 = vrot.lane.b32.xlu0 %v2460_v2, %s2512_s23 }
 0xbda   : > { %v2462_v4 = vpop.eup %2461 }
 0xbdb   : > { %v1472_v7 = vadd.f32 1.0, %v2462_v4 }
 0xbdd   : > { %2463 = vrcp.f32 %v1472_v7 }
 0xbe7   : > { %v2464_v8 = vpop.eup %2463 }
 0xbe8   : > { %v1476_v12 = vmul.f32 %v2464_v8, %v1386_v57 }
 0xc4b   : > { %v1479_v9 = vpop.permute.xlu0 %1478 }
 0xc4c   : > { %v1481_v11 = vmul.f32 %v2464_v8, %v1479_v9 }
 0xc4e   : > { %1483 = vrot.lane.b32.xlu1 %v1481_v11, %s2512_s23  ;;  %v1088_v11 = vadd.f32 %v2755_v41, %v2690_v46 }
 0xcc0   : > { %v1484_v13 = vpop.permute.xlu1 %1483 }
 0xcc1   : > { %v1486_v15 = vadd.f32 %v1484_v13, %v1476_v12 }
 0xcc3   : > { %2465 = vtanh.f32 %v1486_v15 }
 0xccd   : > { %v2466_v16 = vpop.eup %2465 }
 0xcce   : > { %1489 = vrot.lane.b32.xlu0 %v2466_v16, %s2512_s23 }
 0xd40   : > { %v1490_v17 = vpop.permute.xlu0 %1489 }
 0xd41   : > { %v1492_v18 = vmul.f32 %v2464_v8, %v1490_v17 }
 0xd43   : > { %1494 = vrot.lane.b32.xlu1 %v1492_v18, %s2508_s10 }
 0xdb5   : > { %v1495_v19 = vpop.permute.xlu1 %1494 }
 0xdb6   : > { %2250 = vmatmul.mubr.msk.f32.vlgmr.msra.gmra.mrb[18].mxu0 %vm377_vm0, %v1495_v19 }
 0xdb7   : > { %2347 = vmatpush3.bf16.msra.mxu0 %v2637_v5  ;;  %2271 = vmatprep.mubr.msk.f32.mxu0 %vm2510_vm1, %v2511_v14 }
 0xdb8   : > { %2348 = vmatprep.subr.bf16.mxu0 %v2509_v58 }
 0xdbb   : > { %2350 = vmatpush3.bf16.msra.mxu0 %v2641_v6 }
 0xe89   : > { %v1564_v25 = vpop.f32.mrb[18].mxu0 }
 0xe8a   : > { %v1568_v26 = vadd.f32 %v1564_v25, %v1073_v22  ;;  %v2251_v27 = vpop.f32.mrb[19].mxu0 }
 0xe8c   : > { %2467 = vtanh.f32 %v1568_v26  ;;  %v2049_v30 = vmul.f32 -1.442695, %v1568_v26 }
 0xe8e   : > { %2469 = vpow2.f32 %v2049_v30 }
 0xe96   : > { %v2468_v21 = vpop.eup %2467 }
 0xe97   : > { %1578 = vrot.lane.b32.xlu0 %v2468_v21, %s2512_s23 }
 0xe98   : > { %v2470_v20 = vpop.eup %2469 }
 0xe99   : > { %v1572_v31 = vadd.f32 1.0, %v2470_v20 }
 0xe9b   : > { %2471 = vrcp.f32 %v1572_v31 }
 0xea5   : > { %v2472_v24 = vpop.eup %2471 }
 0xea6   : > { %v1576_v34 = vmul.f32 %v2472_v24, %v1486_v15 }
 0xf09   : > { %v1579_v32 = vpop.permute.xlu0 %1578 }
 0xf0a   : > { %v1581_v23 = vmul.f32 %v2472_v24, %v1579_v32 }
 0xf0c   : > { %1583 = vrot.lane.b32.xlu1 %v1581_v23, %s2512_s23 }
 0xf7e   : > { %v1584_v10 = vpop.permute.xlu1 %1583 }
 0xf7f   : > { %v1586_v28 = vadd.f32 %v1584_v10, %v1576_v34 }
 0xf81   : > { %2473 = vtanh.f32 %v1586_v28 }
 0xf8b   : > { %v2474_v29 = vpop.eup %2473 }
 0xf8c   : > { %1589 = vrot.lane.b32.xlu0 %v2474_v29, %s2512_s23 }
 0xffe   : > { %v1590_v35 = vpop.permute.xlu0 %1589 }
 0xfff   : > { %v1592_v36 = vmul.f32 %v2472_v24, %v1590_v35 }
0x1001   : > { %1594 = vrot.lane.b32.xlu1 %v1592_v36, %s2508_s10 }
0x1073   : > { %v1595_v37 = vpop.permute.xlu1 %1594 }
0x1074   : > { %2261 = vmatmul.mubr.msk.f32.vlgmr.msra.gmra.mrb[14].mxu1 %vm377_vm0, %v1595_v37 }
0x1075   : > { %2353 = vmatpush3.bf16.msra.mxu1 %v2637_v5  ;;  %2282 = vmatprep.mubr.msk.f32.mxu1 %vm2510_vm1, %v2511_v14 }
0x1076   : > { %2354 = vmatprep.subr.bf16.mxu1 %v2509_v58 }
0x1079   : > { %2356 = vmatpush3.bf16.msra.mxu1 %v2641_v6 }
0x1147   : > { %v1664_v40 = vpop.f32.mrb[14].mxu1 }
0x1148   : > { %v1668_v43 = vadd.f32 %v1664_v40, %v1078_v38  ;;  %v2262_v44 = vpop.f32.mrb[15].mxu1 }
0x114a   : > { %2475 = vtanh.f32 %v1668_v43  ;;  %v2051_v47 = vmul.f32 -1.442695, %v1668_v43 }
0x114c   : > { %2477 = vpow2.f32 %v2051_v47 }
0x1154   : > { %v2476_v45 = vpop.eup %2475 }
0x1155   : > { %1678 = vrot.lane.b32.xlu0 %v2476_v45, %s2512_s23 }
0x1156   : > { %v2478_v5 = vpop.eup %2477 }
0x1157   : > { %v1672_v48 = vadd.f32 1.0, %v2478_v5 }
0x1159   : > { %2479 = vrcp.f32 %v1672_v48 }
0x1163   : > { %v2480_v14 = vpop.eup %2479 }
0x1164   : > { %v1676_v6 = vmul.f32 %v2480_v14, %v1586_v28 }
0x11c7   : > { %v1679_v49 = vpop.permute.xlu0 %1678 }
0x11c8   : > { %v1681_v58 = vmul.f32 %v2480_v14, %v1679_v49 }
0x11ca   : > { %1683 = vrot.lane.b32.xlu1 %v1681_v58, %s2512_s23 }
0x123c   : > { %v1684_v50 = vpop.permute.xlu1 %1683 }
0x123d   : > { %v1686_v39 = vadd.f32 %v1684_v50, %v1676_v6 }
0x123f   : > { %2481 = vtanh.f32 %v1686_v39 }
0x1249   : > { %v2482_v51 = vpop.eup %2481 }
0x124a   : > { %1689 = vrot.lane.b32.xlu0 %v2482_v51, %s2512_s23 }
0x12bc   : > { %v1690_v52 = vpop.permute.xlu0 %1689 }
0x12bd   : > { %v1692_v53 = vmul.f32 %v2480_v14, %v1690_v52 }
0x12bf   : > { %1694 = vrot.lane.b32.xlu1 %v1692_v53, %s2508_s10 }
0x1331   : > { %v1695_v54 = vpop.permute.xlu1 %1694 }
0x1332   : > { %2272 = vmatmul.mubr.msk.f32.vlgmr.msra.gmra.mrb[20].mxu0 %vm377_vm0, %v1695_v54 }
0x1405   : > { %v1764_v56 = vpop.f32.mrb[20].mxu0 }
0x1406   : > { %v1768_v57 = vadd.f32 %v1764_v56, %v1083_v55  ;;  %v2273_v59 = vpop.f32.mrb[21].mxu0 }
0x1408   : > { %2483 = vtanh.f32 %v1768_v57  ;;  %v2053_v61 = vmul.f32 -1.442695, %v1768_v57 }
0x140a   : > { %2485 = vpow2.f32 %v2053_v61 }
0x1412   : > { %v2484_v60 = vpop.eup %2483 }
0x1413   : > { %1778 = vrot.lane.b32.xlu0 %v2484_v60, %s2512_s23 }
0x1414   : > { %v2486_v62 = vpop.eup %2485 }
0x1415   : > { %v1772_v33 = vadd.f32 1.0, %v2486_v62 }
0x1417   : > { %2487 = vrcp.f32 %v1772_v33 }
0x1421   : > { %v2488_v63 = vpop.eup %2487 }
0x1422   : > { %v1776_v2 = vmul.f32 %v2488_v63, %v1686_v39 }
0x1485   : > { %v1779_v0 = vpop.permute.xlu0 %1778 }
0x1486   : > { %v1781_v1 = vmul.f32 %v2488_v63, %v1779_v0 }
0x1488   : > { %1783 = vrot.lane.b32.xlu1 %v1781_v1, %s2512_s23 }
0x14fa   : > { %v1784_v3 = vpop.permute.xlu1 %1783 }
0x14fb   : > { %v1786_v42 = vadd.f32 %v1784_v3, %v1776_v2 }
0x14fd   : > { %2489 = vtanh.f32 %v1786_v42 }
0x1507   : > { %v2490_v4 = vpop.eup %2489 }
0x1508   : > { %1789 = vrot.lane.b32.xlu0 %v2490_v4, %s2512_s23 }
0x157a   : > { %v1790_v7 = vpop.permute.xlu0 %1789 }
0x157b   : > { %v1792_v8 = vmul.f32 %v2488_v63, %v1790_v7 }
0x157d   : > { %1794 = vrot.lane.b32.xlu1 %v1792_v8, %s2508_s10 }
0x15ef   : > { %v1795_v9 = vpop.permute.xlu1 %1794 }
0x15f0   : > { %2283 = vmatmul.mubr.msk.f32.vlgmr.msra.gmra.mrb[16].mxu1 %vm377_vm0, %v1795_v9 }
0x16c3   : > { %v1864_v12 = vpop.f32.mrb[16].mxu1 }
0x16c4   : > { %v1868_v13 = vadd.f32 %v1864_v12, %v1088_v11  ;;  %v2284_v15 = vpop.f32.mrb[17].mxu1 }
0x16c6   : > { %2491 = vtanh.f32 %v1868_v13  ;;  %v2055_v17 = vmul.f32 -1.442695, %v1868_v13 }
0x16c8   : > { %2493 = vpow2.f32 %v2055_v17 }
0x16d0   : > { %v2492_v16 = vpop.eup %2491 }
0x16d1   : > { %1878 = vrot.lane.b32.xlu0 %v2492_v16, %s2512_s23 }
0x16d2   : > { %v2494_v18 = vpop.eup %2493 }
0x16d3   : > { %v1872_v19 = vadd.f32 1.0, %v2494_v18 }
0x16d5   : > { %2495 = vrcp.f32 %v1872_v19 }
0x16df   : > { %v2496_v22 = vpop.eup %2495 }
0x16e0   : > { %v1876_v27 = vmul.f32 %v2496_v22, %v1786_v42 }
0x1743   : > { %v1879_v25 = vpop.permute.xlu0 %1878 }
0x1744   : > { %v1881_v26 = vmul.f32 %v2496_v22, %v1879_v25 }
0x1746   : > { %1883 = vrot.lane.b32.xlu1 %v1881_v26, %s2512_s23 }
0x17b8   : > { %v1884_v46 = vpop.permute.xlu1 %1883 }
0x17b9   : > { %v1886_v41 = vadd.f32 %v1884_v46, %v1876_v27 }
0x17bb   : > { %2497 = vtanh.f32 %v1886_v41 }
0x17c5   : > { %v2498_v21 = vpop.eup %2497 }
0x17c6   : > { %1889 = vrot.lane.b32.xlu0 %v2498_v21, %s2512_s23 }
0x1838   : > { %v1890_v30 = vpop.permute.xlu0 %1889 }
0x1839   : > { %v1892_v20 = vmul.f32 %v2496_v22, %v1890_v30 }
0x183b   : > { %1894 = vrot.lane.b32.xlu1 %v1892_v20, %s2508_s10 }
0x18ad   : > { %v1895_v31 = vpop.permute.xlu1 %1894 }
0x18ae   : > { %v1897_v24 = vsel %vm377_vm0, %v1895_v31, %v1886_v41 }
0x18af   : > { %1899 = vst.msk [vmem:[%s357_s29] sm:$0xff] %vm1898_vm2, %v1897_v24 }
0x18b0 PF: > { %s18_s27 = sadd.s32 1, %s2505_s27  }
0x18b1   : > { %p15_p4 = scmp.ge.s32.totalorder %s18_s27, 4  }
0x18b3   :  { %17 = sbr.rel (!%p15_p4) target bundleno = 1 (0x1), region = 91 }

</bundles_post_ra>
